<compile_context>
chip_gen: v7x
topology: tpu7x:2x2x1
jax: 0.10.0
libtpu: 0.0.40
codegen_flags: <defaults>
</compile_context>

<pallas_src>
import jax
import jax.numpy as jnp
import numpy as np
from jax.experimental import pallas as pl
from jax.experimental.pallas import tpu as pltpu


def sentiment_lstm_kernel(
    tok_ref,     # (T*B, 1) int32   time-major flattened token ids
    fused0_ref,  # (Vp, 4H) f32     embedding @ W_ih0 + b0 (zero-padded vocab)
    whh0_ref,    # (H, 4H)          layer-0 hidden weights (pre-transposed)
    wih1_ref,    # (H, 4H)          layer-1 input weights  (pre-transposed)
    whh1_ref,    # (H, 4H)          layer-1 hidden weights (pre-transposed)
    b1_ref,      # (1, 4H)          layer-1 bias (b_ih + b_hh)
    wfc_ref,     # (H, O)           fc weight (pre-transposed)
    bfc_ref,     # (1, O)           fc bias
    h0_ref,      # (2, B, H)        initial hidden states
    c0_ref,      # (2, B, H)        initial cell states
    out_ref,     # (B, O)           log_softmax output at last time step
    hn_ref,      # (2, B, H)        final hidden states
    cn_ref,      # (2, B, H)        final cell states
):
    TB = tok_ref.shape[0]
    Vp = fused0_ref.shape[0]
    H = whh0_ref.shape[0]
    B = h0_ref.shape[1]
    T = TB // B
    f32 = jnp.float32

    # ---- fused embedding + layer-0 input projection (+ bias): ONE matmul ----
    tok = tok_ref[...]                                              # (T*B, 1)
    onehot = (tok == jax.lax.broadcasted_iota(jnp.int32, (TB, Vp), 1)).astype(f32)
    in_gates0 = jnp.dot(onehot, fused0_ref[...],
                        preferred_element_type=f32)                 # (T*B, 4H)

    whh0 = whh0_ref[...]
    wih1 = wih1_ref[...]
    whh1 = whh1_ref[...]
    b1 = b1_ref[...]

    def gate_act(gates, c):
        # Full-lane activations (2 EUP pushes), slice i/f/g/o afterwards.
        sig = jax.nn.sigmoid(gates)
        th = jnp.tanh(gates)
        i = sig[:, 0 * H:1 * H]
        f = sig[:, 1 * H:2 * H]
        o = sig[:, 3 * H:4 * H]
        g = th[:, 2 * H:3 * H]
        c_new = f * c + i * g
        h_new = o * jnp.tanh(c_new)
        return h_new, c_new

    h0 = h0_ref[0]
    c0 = c0_ref[0]
    h1 = h0_ref[1]
    c1 = c0_ref[1]

    # TODO(synk): nn.LSTM inter-layer dropout (p=0.5) and nn.Dropout(p=0.3) are
    # training-only stochastic ops; eval-mode forward is the identity, omitted.

    # Software-pipelined recurrence: iteration t = layer-0 step t + layer-1
    # step t-1; every matmul below depends only on previous-iteration state,
    # so they overlap on the MXU.  T is small & static -> unrolled.
    for t in range(T):
        g0 = in_gates0[t * B:(t + 1) * B, :] + jnp.dot(
            h0, whh0, preferred_element_type=f32)
        if t > 0:
            g1 = (jnp.dot(h0, wih1, preferred_element_type=f32)
                  + jnp.dot(h1, whh1, preferred_element_type=f32) + b1)
            h1, c1 = gate_act(g1, c1)
        h0, c0 = gate_act(g0, c0)

    # Epilogue: layer-1 step T-1 consumes layer-0's last output.
    g1 = (jnp.dot(h0, wih1, preferred_element_type=f32)
          + jnp.dot(h1, whh1, preferred_element_type=f32) + b1)
    h1, c1 = gate_act(g1, c1)

    hn_ref[0] = h0
    cn_ref[0] = c0
    hn_ref[1] = h1
    cn_ref[1] = c1

    # ---- fc + log_softmax on the last time step (top layer) ----
    # (log_softmax over dim=1 of (B*T, O) followed by [:, -1, :] == this.)
    logits = jnp.dot(h1, wfc_ref[...], preferred_element_type=f32) + bfc_ref[...]
    m = jnp.max(logits, axis=1, keepdims=True)
    shifted = logits - m
    lse = jnp.log(jnp.sum(jnp.exp(shifted), axis=1, keepdims=True))
    # TODO(synk): out/hn/cn last dims (5 / 32) are lane-sparse -> masked vst;
    # negligible here, pad O to 128 (-inf bias cols) only if stores matter.
    out_ref[...] = shifted - lse


@jax.jit
def sentiment_rnn_forward(x_tokens, params, h0, c0):
    """x_tokens: (B, T) int32. Returns (soft_out (B, O), (h_n, c_n))."""
    B, T = x_tokens.shape
    H = params["whh0"].shape[0]
    O = params["wfc"].shape[1]
    V = params["embedding"].shape[0]
    Vp = ((V + 7) // 8) * 8  # sublane-align the fused table

    # Parameter-only precompute: fold embedding lookup + layer-0 input
    # projection + layer-0 bias into one (vocab, 4H) table.
    fused0 = params["embedding"] @ params["wih0"] + params["b0"]
    if Vp != V:
        fused0 = jnp.pad(fused0, ((0, Vp - V), (0, 0)))

    # Time-major flattened token ids (replaces gather + (B,T,E) transpose).
    tok_tm = jnp.transpose(x_tokens).reshape(T * B, 1).astype(jnp.int32)

    vmem = pl.BlockSpec(memory_space=pltpu.MemorySpace.VMEM)
    # TODO(synk): at real sizes (vocab ~50k, large B/T) keep fused0 in HBM
    # (memory_space=pl.ANY) with scalar-prefetched token ids and add a
    # "parallel" grid axis over B (v7x: 2 TCs, 64 MiB VMEM); at these toy
    # shapes everything fits VMEM and a single grid point is optimal.
    soft_out, hn, cn = pl.pallas_call(
        sentiment_lstm_kernel,
        out_shape=(
            jax.ShapeDtypeStruct((B, O), jnp.float32),
            jax.ShapeDtypeStruct((2, B, H), jnp.float32),
            jax.ShapeDtypeStruct((2, B, H), jnp.float32),
        ),
        in_specs=[vmem] * 10,
        out_specs=(vmem, vmem, vmem),
    )(tok_tm, fused0,
      params["whh0"], params["wih1"], params["whh1"], params["b1"],
      params["wfc"], params["bfc"], h0, c0)
    return soft_out, (hn, cn)


def _reference_forward(x_tokens, params, h0, c0):
    """Pure-JAX reference (same math, original un-fused params)."""
    embeds = jnp.take(params["embedding"], x_tokens, axis=0)
    H = params["whh0"].shape[0]

    def cell(x, h, c, wih, whh, b):
        g = x @ wih + h @ whh + b
        i = jax.nn.sigmoid(g[:, :H])
        f = jax.nn.sigmoid(g[:, H:2 * H])
        gg = jnp.tanh(g[:, 2 * H:3 * H])
        o = jax.nn.sigmoid(g[:, 3 * H:])
        c = f * c + i * gg
        return o * jnp.tanh(c), c

    T = x_tokens.shape[1]
    h_a, c_a = h0[0], c0[0]
    outs0 = []
    for t in range(T):
        h_a, c_a = cell(embeds[:, t, :], h_a, c_a,
                        params["wih0"], params["whh0"], params["b0"])
        outs0.append(h_a)
    h_b, c_b = h0[1], c0[1]
    for t in range(T):
        h_b, c_b = cell(outs0[t], h_b, c_b,
                        params["wih1"], params["whh1"], params["b1"])
    logits = h_b @ params["wfc"] + params["bfc"]
    soft = jax.nn.log_softmax(logits, axis=1)
    return soft, jnp.stack([h_a, h_b]), jnp.stack([c_a, c_b])


if __name__ == "__main__":
    # Small shapes consistent with the module's forward.
    B, T = 8, 8
    vocab_size = 50
    E, H, O, n_layers = 32, 32, 5, 2

    key = jax.random.PRNGKey(0)
    ks = jax.random.split(key, 10)
    bound = 1.0 / float(H) ** 0.5

    def u(k, shape):
        return jax.random.uniform(k, shape, jnp.float32, -bound, bound)

    params = {
        "embedding": jax.random.normal(ks[0], (vocab_size, E), jnp.float32),
        "wih0": u(ks[1], (E, 4 * H)),
        "whh0": u(ks[2], (H, 4 * H)),
        "b0":   u(ks[3], (1, 4 * H)),     # bias_ih_l0 + bias_hh_l0
        "wih1": u(ks[4], (H, 4 * H)),
        "whh1": u(ks[5], (H, 4 * H)),
        "b1":   u(ks[6], (1, 4 * H)),     # bias_ih_l1 + bias_hh_l1
        "wfc":  u(ks[7], (H, O)),
        "bfc":  u(ks[8], (1, O)),
    }
    x = jax.random.randint(ks[9], (B, T), 0, vocab_size, dtype=jnp.int32)
    h0 = jnp.zeros((n_layers, B, H), jnp.float32)
    c0 = jnp.zeros((n_layers, B, H), jnp.float32)

    soft_out, (hn, cn) = sentiment_rnn_forward(x, params, h0, c0)
    jax.block_until_ready((soft_out, hn, cn))

    ref_soft, ref_hn, ref_cn = _reference_forward(x, params, h0, c0)
    np.testing.assert_allclose(np.asarray(soft_out), np.asarray(ref_soft),
                               atol=1e-3, rtol=1e-3)
    np.testing.assert_allclose(np.asarray(hn), np.asarray(ref_hn),
                               atol=1e-3, rtol=1e-3)
    np.testing.assert_allclose(np.asarray(cn), np.asarray(ref_cn),
                               atol=1e-3, rtol=1e-3)

    print("KERNEL_OK")
</pallas_src>

<mosaic_0001>
module attributes {stable_mosaic.version = 11 : i64} {
  func.func @sentiment_lstm_kernel(%arg0: memref<64x1xi32, #tpu.memory_space<vmem>>, %arg1: memref<56x128xf32, #tpu.memory_space<vmem>>, %arg2: memref<32x128xf32, #tpu.memory_space<vmem>>, %arg3: memref<32x128xf32, #tpu.memory_space<vmem>>, %arg4: memref<32x128xf32, #tpu.memory_space<vmem>>, %arg5: memref<1x128xf32, #tpu.memory_space<vmem>>, %arg6: memref<32x5xf32, #tpu.memory_space<vmem>>, %arg7: memref<1x5xf32, #tpu.memory_space<vmem>>, %arg8: memref<2x8x32xf32, #tpu.memory_space<vmem>>, %arg9: memref<2x8x32xf32, #tpu.memory_space<vmem>>, %arg10: memref<8x5xf32, #tpu.memory_space<vmem>>, %arg11: memref<2x8x32xf32, #tpu.memory_space<vmem>>, %arg12: memref<2x8x32xf32, #tpu.memory_space<vmem>>) attributes {dimension_semantics = [], scalar_prefetch = 0 : i64, scratch_operands = 0 : i64, tpu.core_type = #tpu.core_type<tc>} {
    %c0 = arith.constant 0 : index
    %c0_0 = arith.constant 0 : index
    %0 = vector.load %arg0[%c0, %c0_0] : memref<64x1xi32, #tpu.memory_space<vmem>>, vector<64x1xi32>
    %1 = tpu.iota {dimensions = array<i32: 1>} : vector<64x56xi32>
    %2 = vector.broadcast %0 : vector<64x1xi32> to vector<64x56xi32>
    %3 = arith.cmpi eq, %2, %1 : vector<64x56xi32>
    %4 = arith.extui %3 : vector<64x56xi1> to vector<64x56xi32>
    %5 = arith.sitofp %4 : vector<64x56xi32> to vector<64x56xf32>
    %c0_1 = arith.constant 0 : index
    %c0_2 = arith.constant 0 : index
    %6 = vector.load %arg1[%c0_1, %c0_2] : memref<56x128xf32, #tpu.memory_space<vmem>>, vector<56x128xf32>
    %cst = arith.constant dense<0.000000e+00> : vector<64x128xf32>
    %7 = tpu.matmul %5, %6, %cst {dimension_numbers = #tpu.dot_dimension_numbers<[1], [0], [0], [1], [0, 0, 1, 1], [], []>} : vector<64x56xf32>, vector<56x128xf32>, vector<64x128xf32> -> vector<64x128xf32>
    %c0_3 = arith.constant 0 : index
    %c0_4 = arith.constant 0 : index
    %8 = vector.load %arg2[%c0_3, %c0_4] : memref<32x128xf32, #tpu.memory_space<vmem>>, vector<32x128xf32>
    %c0_5 = arith.constant 0 : index
    %c0_6 = arith.constant 0 : index
    %9 = vector.load %arg3[%c0_5, %c0_6] : memref<32x128xf32, #tpu.memory_space<vmem>>, vector<32x128xf32>
    %c0_7 = arith.constant 0 : index
    %c0_8 = arith.constant 0 : index
    %10 = vector.load %arg4[%c0_7, %c0_8] : memref<32x128xf32, #tpu.memory_space<vmem>>, vector<32x128xf32>
    %c0_9 = arith.constant 0 : index
    %c0_10 = arith.constant 0 : index
    %11 = vector.load %arg5[%c0_9, %c0_10] : memref<1x128xf32, #tpu.memory_space<vmem>>, vector<1x128xf32>
    %c0_11 = arith.constant 0 : index
    %c0_12 = arith.constant 0 : index
    %c0_13 = arith.constant 0 : index
    %12 = vector.load %arg8[%c0_11, %c0_12, %c0_13] : memref<2x8x32xf32, #tpu.memory_space<vmem>>, vector<1x8x32xf32>
    %13 = vector.shape_cast %12 : vector<1x8x32xf32> to vector<8x32xf32>
    %c0_14 = arith.constant 0 : index
    %c0_15 = arith.constant 0 : index
    %c0_16 = arith.constant 0 : index
    %14 = vector.load %arg9[%c0_14, %c0_15, %c0_16] : memref<2x8x32xf32, #tpu.memory_space<vmem>>, vector<1x8x32xf32>
    %15 = vector.shape_cast %14 : vector<1x8x32xf32> to vector<8x32xf32>
    %c1 = arith.constant 1 : index
    %c0_17 = arith.constant 0 : index
    %c0_18 = arith.constant 0 : index
    %16 = vector.load %arg8[%c1, %c0_17, %c0_18] : memref<2x8x32xf32, #tpu.memory_space<vmem>>, vector<1x8x32xf32>
    %17 = vector.shape_cast %16 : vector<1x8x32xf32> to vector<8x32xf32>
    %c1_19 = arith.constant 1 : index
    %c0_20 = arith.constant 0 : index
    %c0_21 = arith.constant 0 : index
    %18 = vector.load %arg9[%c1_19, %c0_20, %c0_21] : memref<2x8x32xf32, #tpu.memory_space<vmem>>, vector<1x8x32xf32>
    %19 = vector.shape_cast %18 : vector<1x8x32xf32> to vector<8x32xf32>
    %20 = vector.extract_strided_slice %7 {offsets = [0, 0], sizes = [8, 128], strides = [1, 1]} : vector<64x128xf32> to vector<8x128xf32>
    %cst_22 = arith.constant dense<0.000000e+00> : vector<8x128xf32>
    %21 = tpu.matmul %13, %8, %cst_22 {dimension_numbers = #tpu.dot_dimension_numbers<[1], [0], [0], [1], [0, 0, 1, 1], [], []>} : vector<8x32xf32>, vector<32x128xf32>, vector<8x128xf32> -> vector<8x128xf32>
    %22 = arith.addf %20, %21 : vector<8x128xf32>
    %23 = arith.negf %22 : vector<8x128xf32>
    %24 = math.exp %23 : vector<8x128xf32>
    %cst_23 = arith.constant 1.000000e+00 : f32
    %25 = vector.broadcast %cst_23 : f32 to vector<8x128xf32>
    %26 = arith.addf %25, %24 : vector<8x128xf32>
    %27 = arith.divf %25, %26 : vector<8x128xf32>
    %28 = math.tanh %22 : vector<8x128xf32>
    %29 = vector.extract_strided_slice %27 {offsets = [0, 0], sizes = [8, 32], strides = [1, 1]} : vector<8x128xf32> to vector<8x32xf32>
    %30 = vector.extract_strided_slice %27 {offsets = [0, 32], sizes = [8, 32], strides = [1, 1]} : vector<8x128xf32> to vector<8x32xf32>
    %31 = vector.extract_strided_slice %27 {offsets = [0, 96], sizes = [8, 32], strides = [1, 1]} : vector<8x128xf32> to vector<8x32xf32>
    %32 = vector.extract_strided_slice %28 {offsets = [0, 64], sizes = [8, 32], strides = [1, 1]} : vector<8x128xf32> to vector<8x32xf32>
    %33 = arith.mulf %30, %15 : vector<8x32xf32>
    %34 = arith.mulf %29, %32 : vector<8x32xf32>
    %35 = arith.addf %33, %34 : vector<8x32xf32>
    %36 = math.tanh %35 : vector<8x32xf32>
    %37 = arith.mulf %31, %36 : vector<8x32xf32>
    %38 = vector.extract_strided_slice %7 {offsets = [8, 0], sizes = [8, 128], strides = [1, 1]} : vector<64x128xf32> to vector<8x128xf32>
    %cst_24 = arith.constant dense<0.000000e+00> : vector<8x128xf32>
    %39 = tpu.matmul %37, %8, %cst_24 {dimension_numbers = #tpu.dot_dimension_numbers<[1], [0], [0], [1], [0, 0, 1, 1], [], []>} : vector<8x32xf32>, vector<32x128xf32>, vector<8x128xf32> -> vector<8x128xf32>
    %40 = arith.addf %38, %39 : vector<8x128xf32>
    %cst_25 = arith.constant dense<0.000000e+00> : vector<8x128xf32>
    %41 = tpu.matmul %37, %9, %cst_25 {dimension_numbers = #tpu.dot_dimension_numbers<[1], [0], [0], [1], [0, 0, 1, 1], [], []>} : vector<8x32xf32>, vector<32x128xf32>, vector<8x128xf32> -> vector<8x128xf32>
    %cst_26 = arith.constant dense<0.000000e+00> : vector<8x128xf32>
    %42 = tpu.matmul %17, %10, %cst_26 {dimension_numbers = #tpu.dot_dimension_numbers<[1], [0], [0], [1], [0, 0, 1, 1], [], []>} : vector<8x32xf32>, vector<32x128xf32>, vector<8x128xf32> -> vector<8x128xf32>
    %43 = arith.addf %41, %42 : vector<8x128xf32>
    %44 = vector.broadcast %11 : vector<1x128xf32> to vector<8x128xf32>
    %45 = arith.addf %43, %44 : vector<8x128xf32>
    %46 = arith.negf %45 : vector<8x128xf32>
    %47 = math.exp %46 : vector<8x128xf32>
    %cst_27 = arith.constant 1.000000e+00 : f32
    %48 = vector.broadcast %cst_27 : f32 to vector<8x128xf32>
    %49 = arith.addf %48, %47 : vector<8x128xf32>
    %50 = arith.divf %48, %49 : vector<8x128xf32>
    %51 = math.tanh %45 : vector<8x128xf32>
    %52 = vector.extract_strided_slice %50 {offsets = [0, 0], sizes = [8, 32], strides = [1, 1]} : vector<8x128xf32> to vector<8x32xf32>
    %53 = vector.extract_strided_slice %50 {offsets = [0, 32], sizes = [8, 32], strides = [1, 1]} : vector<8x128xf32> to vector<8x32xf32>
    %54 = vector.extract_strided_slice %50 {offsets = [0, 96], sizes = [8, 32], strides = [1, 1]} : vector<8x128xf32> to vector<8x32xf32>
    %55 = vector.extract_strided_slice %51 {offsets = [0, 64], sizes = [8, 32], strides = [1, 1]} : vector<8x128xf32> to vector<8x32xf32>
    %56 = arith.mulf %53, %19 : vector<8x32xf32>
    %57 = arith.mulf %52, %55 : vector<8x32xf32>
    %58 = arith.addf %56, %57 : vector<8x32xf32>
    %59 = math.tanh %58 : vector<8x32xf32>
    %60 = arith.mulf %54, %59 : vector<8x32xf32>
    %61 = arith.negf %40 : vector<8x128xf32>
    %62 = math.exp %61 : vector<8x128xf32>
    %cst_28 = arith.constant 1.000000e+00 : f32
    %63 = vector.broadcast %cst_28 : f32 to vector<8x128xf32>
    %64 = arith.addf %63, %62 : vector<8x128xf32>
    %65 = arith.divf %63, %64 : vector<8x128xf32>
    %66 = math.tanh %40 : vector<8x128xf32>
    %67 = vector.extract_strided_slice %65 {offsets = [0, 0], sizes = [8, 32], strides = [1, 1]} : vector<8x128xf32> to vector<8x32xf32>
    %68 = vector.extract_strided_slice %65 {offsets = [0, 32], sizes = [8, 32], strides = [1, 1]} : vector<8x128xf32> to vector<8x32xf32>
    %69 = vector.extract_strided_slice %65 {offsets = [0, 96], sizes = [8, 32], strides = [1, 1]} : vector<8x128xf32> to vector<8x32xf32>
    %70 = vector.extract_strided_slice %66 {offsets = [0, 64], sizes = [8, 32], strides = [1, 1]} : vector<8x128xf32> to vector<8x32xf32>
    %71 = arith.mulf %68, %35 : vector<8x32xf32>
    %72 = arith.mulf %67, %70 : vector<8x32xf32>
    %73 = arith.addf %71, %72 : vector<8x32xf32>
    %74 = math.tanh %73 : vector<8x32xf32>
    %75 = arith.mulf %69, %74 : vector<8x32xf32>
    %76 = vector.extract_strided_slice %7 {offsets = [16, 0], sizes = [8, 128], strides = [1, 1]} : vector<64x128xf32> to vector<8x128xf32>
    %cst_29 = arith.constant dense<0.000000e+00> : vector<8x128xf32>
    %77 = tpu.matmul %75, %8, %cst_29 {dimension_numbers = #tpu.dot_dimension_numbers<[1], [0], [0], [1], [0, 0, 1, 1], [], []>} : vector<8x32xf32>, vector<32x128xf32>, vector<8x128xf32> -> vector<8x128xf32>
    %78 = arith.addf %76, %77 : vector<8x128xf32>
    %cst_30 = arith.constant dense<0.000000e+00> : vector<8x128xf32>
    %79 = tpu.matmul %75, %9, %cst_30 {dimension_numbers = #tpu.dot_dimension_numbers<[1], [0], [0], [1], [0, 0, 1, 1], [], []>} : vector<8x32xf32>, vector<32x128xf32>, vector<8x128xf32> -> vector<8x128xf32>
    %cst_31 = arith.constant dense<0.000000e+00> : vector<8x128xf32>
    %80 = tpu.matmul %60, %10, %cst_31 {dimension_numbers = #tpu.dot_dimension_numbers<[1], [0], [0], [1], [0, 0, 1, 1], [], []>} : vector<8x32xf32>, vector<32x128xf32>, vector<8x128xf32> -> vector<8x128xf32>
    %81 = arith.addf %79, %80 : vector<8x128xf32>
    %82 = vector.broadcast %11 : vector<1x128xf32> to vector<8x128xf32>
    %83 = arith.addf %81, %82 : vector<8x128xf32>
    %84 = arith.negf %83 : vector<8x128xf32>
    %85 = math.exp %84 : vector<8x128xf32>
    %cst_32 = arith.constant 1.000000e+00 : f32
    %86 = vector.broadcast %cst_32 : f32 to vector<8x128xf32>
    %87 = arith.addf %86, %85 : vector<8x128xf32>
    %88 = arith.divf %86, %87 : vector<8x128xf32>
    %89 = math.tanh %83 : vector<8x128xf32>
    %90 = vector.extract_strided_slice %88 {offsets = [0, 0], sizes = [8, 32], strides = [1, 1]} : vector<8x128xf32> to vector<8x32xf32>
    %91 = vector.extract_strided_slice %88 {offsets = [0, 32], sizes = [8, 32], strides = [1, 1]} : vector<8x128xf32> to vector<8x32xf32>
    %92 = vector.extract_strided_slice %88 {offsets = [0, 96], sizes = [8, 32], strides = [1, 1]} : vector<8x128xf32> to vector<8x32xf32>
    %93 = vector.extract_strided_slice %89 {offsets = [0, 64], sizes = [8, 32], strides = [1, 1]} : vector<8x128xf32> to vector<8x32xf32>
    %94 = arith.mulf %91, %58 : vector<8x32xf32>
    %95 = arith.mulf %90, %93 : vector<8x32xf32>
    %96 = arith.addf %94, %95 : vector<8x32xf32>
    %97 = math.tanh %96 : vector<8x32xf32>
    %98 = arith.mulf %92, %97 : vector<8x32xf32>
    %99 = arith.negf %78 : vector<8x128xf32>
    %100 = math.exp %99 : vector<8x128xf32>
    %cst_33 = arith.constant 1.000000e+00 : f32
    %101 = vector.broadcast %cst_33 : f32 to vector<8x128xf32>
    %102 = arith.addf %101, %100 : vector<8x128xf32>
    %103 = arith.divf %101, %102 : vector<8x128xf32>
    %104 = math.tanh %78 : vector<8x128xf32>
    %105 = vector.extract_strided_slice %103 {offsets = [0, 0], sizes = [8, 32], strides = [1, 1]} : vector<8x128xf32> to vector<8x32xf32>
    %106 = vector.extract_strided_slice %103 {offsets = [0, 32], sizes = [8, 32], strides = [1, 1]} : vector<8x128xf32> to vector<8x32xf32>
    %107 = vector.extract_strided_slice %103 {offsets = [0, 96], sizes = [8, 32], strides = [1, 1]} : vector<8x128xf32> to vector<8x32xf32>
    %108 = vector.extract_strided_slice %104 {offsets = [0, 64], sizes = [8, 32], strides = [1, 1]} : vector<8x128xf32> to vector<8x32xf32>
    %109 = arith.mulf %106, %73 : vector<8x32xf32>
    %110 = arith.mulf %105, %108 : vector<8x32xf32>
    %111 = arith.addf %109, %110 : vector<8x32xf32>
    %112 = math.tanh %111 : vector<8x32xf32>
    %113 = arith.mulf %107, %112 : vector<8x32xf32>
    %114 = vector.extract_strided_slice %7 {offsets = [24, 0], sizes = [8, 128], strides = [1, 1]} : vector<64x128xf32> to vector<8x128xf32>
    %cst_34 = arith.constant dense<0.000000e+00> : vector<8x128xf32>
    %115 = tpu.matmul %113, %8, %cst_34 {dimension_numbers = #tpu.dot_dimension_numbers<[1], [0], [0], [1], [0, 0, 1, 1], [], []>} : vector<8x32xf32>, vector<32x128xf32>, vector<8x128xf32> -> vector<8x128xf32>
    %116 = arith.addf %114, %115 : vector<8x128xf32>
    %cst_35 = arith.constant dense<0.000000e+00> : vector<8x128xf32>
    %117 = tpu.matmul %113, %9, %cst_35 {dimension_numbers = #tpu.dot_dimension_numbers<[1], [0], [0], [1], [0, 0, 1, 1], [], []>} : vector<8x32xf32>, vector<32x128xf32>, vector<8x128xf32> -> vector<8x128xf32>
    %cst_36 = arith.constant dense<0.000000e+00> : vector<8x128xf32>
    %118 = tpu.matmul %98, %10, %cst_36 {dimension_numbers = #tpu.dot_dimension_numbers<[1], [0], [0], [1], [0, 0, 1, 1], [], []>} : vector<8x32xf32>, vector<32x128xf32>, vector<8x128xf32> -> vector<8x128xf32>
    %119 = arith.addf %117, %118 : vector<8x128xf32>
    %120 = vector.broadcast %11 : vector<1x128xf32> to vector<8x128xf32>
    %121 = arith.addf %119, %120 : vector<8x128xf32>
    %122 = arith.negf %121 : vector<8x128xf32>
    %123 = math.exp %122 : vector<8x128xf32>
    %cst_37 = arith.constant 1.000000e+00 : f32
    %124 = vector.broadcast %cst_37 : f32 to vector<8x128xf32>
    %125 = arith.addf %124, %123 : vector<8x128xf32>
    %126 = arith.divf %124, %125 : vector<8x128xf32>
    %127 = math.tanh %121 : vector<8x128xf32>
    %128 = vector.extract_strided_slice %126 {offsets = [0, 0], sizes = [8, 32], strides = [1, 1]} : vector<8x128xf32> to vector<8x32xf32>
    %129 = vector.extract_strided_slice %126 {offsets = [0, 32], sizes = [8, 32], strides = [1, 1]} : vector<8x128xf32> to vector<8x32xf32>
    %130 = vector.extract_strided_slice %126 {offsets = [0, 96], sizes = [8, 32], strides = [1, 1]} : vector<8x128xf32> to vector<8x32xf32>
    %131 = vector.extract_strided_slice %127 {offsets = [0, 64], sizes = [8, 32], strides = [1, 1]} : vector<8x128xf32> to vector<8x32xf32>
    %132 = arith.mulf %129, %96 : vector<8x32xf32>
    %133 = arith.mulf %128, %131 : vector<8x32xf32>
    %134 = arith.addf %132, %133 : vector<8x32xf32>
    %135 = math.tanh %134 : vector<8x32xf32>
    %136 = arith.mulf %130, %135 : vector<8x32xf32>
    %137 = arith.negf %116 : vector<8x128xf32>
    %138 = math.exp %137 : vector<8x128xf32>
    %cst_38 = arith.constant 1.000000e+00 : f32
    %139 = vector.broadcast %cst_38 : f32 to vector<8x128xf32>
    %140 = arith.addf %139, %138 : vector<8x128xf32>
    %141 = arith.divf %139, %140 : vector<8x128xf32>
    %142 = math.tanh %116 : vector<8x128xf32>
    %143 = vector.extract_strided_slice %141 {offsets = [0, 0], sizes = [8, 32], strides = [1, 1]} : vector<8x128xf32> to vector<8x32xf32>
    %144 = vector.extract_strided_slice %141 {offsets = [0, 32], sizes = [8, 32], strides = [1, 1]} : vector<8x128xf32> to vector<8x32xf32>
    %145 = vector.extract_strided_slice %141 {offsets = [0, 96], sizes = [8, 32], strides = [1, 1]} : vector<8x128xf32> to vector<8x32xf32>
    %146 = vector.extract_strided_slice %142 {offsets = [0, 64], sizes = [8, 32], strides = [1, 1]} : vector<8x128xf32> to vector<8x32xf32>
    %147 = arith.mulf %144, %111 : vector<8x32xf32>
    %148 = arith.mulf %143, %146 : vector<8x32xf32>
    %149 = arith.addf %147, %148 : vector<8x32xf32>
    %150 = math.tanh %149 : vector<8x32xf32>
    %151 = arith.mulf %145, %150 : vector<8x32xf32>
    %152 = vector.extract_strided_slice %7 {offsets = [32, 0], sizes = [8, 128], strides = [1, 1]} : vector<64x128xf32> to vector<8x128xf32>
    %cst_39 = arith.constant dense<0.000000e+00> : vector<8x128xf32>
    %153 = tpu.matmul %151, %8, %cst_39 {dimension_numbers = #tpu.dot_dimension_numbers<[1], [0], [0], [1], [0, 0, 1, 1], [], []>} : vector<8x32xf32>, vector<32x128xf32>, vector<8x128xf32> -> vector<8x128xf32>
    %154 = arith.addf %152, %153 : vector<8x128xf32>
    %cst_40 = arith.constant dense<0.000000e+00> : vector<8x128xf32>
    %155 = tpu.matmul %151, %9, %cst_40 {dimension_numbers = #tpu.dot_dimension_numbers<[1], [0], [0], [1], [0, 0, 1, 1], [], []>} : vector<8x32xf32>, vector<32x128xf32>, vector<8x128xf32> -> vector<8x128xf32>
    %cst_41 = arith.constant dense<0.000000e+00> : vector<8x128xf32>
    %156 = tpu.matmul %136, %10, %cst_41 {dimension_numbers = #tpu.dot_dimension_numbers<[1], [0], [0], [1], [0, 0, 1, 1], [], []>} : vector<8x32xf32>, vector<32x128xf32>, vector<8x128xf32> -> vector<8x128xf32>
    %157 = arith.addf %155, %156 : vector<8x128xf32>
    %158 = vector.broadcast %11 : vector<1x128xf32> to vector<8x128xf32>
    %159 = arith.addf %157, %158 : vector<8x128xf32>
    %160 = arith.negf %159 : vector<8x128xf32>
    %161 = math.exp %160 : vector<8x128xf32>
    %cst_42 = arith.constant 1.000000e+00 : f32
    %162 = vector.broadcast %cst_42 : f32 to vector<8x128xf32>
    %163 = arith.addf %162, %161 : vector<8x128xf32>
    %164 = arith.divf %162, %163 : vector<8x128xf32>
    %165 = math.tanh %159 : vector<8x128xf32>
    %166 = vector.extract_strided_slice %164 {offsets = [0, 0], sizes = [8, 32], strides = [1, 1]} : vector<8x128xf32> to vector<8x32xf32>
    %167 = vector.extract_strided_slice %164 {offsets = [0, 32], sizes = [8, 32], strides = [1, 1]} : vector<8x128xf32> to vector<8x32xf32>
    %168 = vector.extract_strided_slice %164 {offsets = [0, 96], sizes = [8, 32], strides = [1, 1]} : vector<8x128xf32> to vector<8x32xf32>
    %169 = vector.extract_strided_slice %165 {offsets = [0, 64], sizes = [8, 32], strides = [1, 1]} : vector<8x128xf32> to vector<8x32xf32>
    %170 = arith.mulf %167, %134 : vector<8x32xf32>
    %171 = arith.mulf %166, %169 : vector<8x32xf32>
    %172 = arith.addf %170, %171 : vector<8x32xf32>
    %173 = math.tanh %172 : vector<8x32xf32>
    %174 = arith.mulf %168, %173 : vector<8x32xf32>
    %175 = arith.negf %154 : vector<8x128xf32>
    %176 = math.exp %175 : vector<8x128xf32>
    %cst_43 = arith.constant 1.000000e+00 : f32
    %177 = vector.broadcast %cst_43 : f32 to vector<8x128xf32>
    %178 = arith.addf %177, %176 : vector<8x128xf32>
    %179 = arith.divf %177, %178 : vector<8x128xf32>
    %180 = math.tanh %154 : vector<8x128xf32>
    %181 = vector.extract_strided_slice %179 {offsets = [0, 0], sizes = [8, 32], strides = [1, 1]} : vector<8x128xf32> to vector<8x32xf32>
    %182 = vector.extract_strided_slice %179 {offsets = [0, 32], sizes = [8, 32], strides = [1, 1]} : vector<8x128xf32> to vector<8x32xf32>
    %183 = vector.extract_strided_slice %179 {offsets = [0, 96], sizes = [8, 32], strides = [1, 1]} : vector<8x128xf32> to vector<8x32xf32>
    %184 = vector.extract_strided_slice %180 {offsets = [0, 64], sizes = [8, 32], strides = [1, 1]} : vector<8x128xf32> to vector<8x32xf32>
    %185 = arith.mulf %182, %149 : vector<8x32xf32>
    %186 = arith.mulf %181, %184 : vector<8x32xf32>
    %187 = arith.addf %185, %186 : vector<8x32xf32>
    %188 = math.tanh %187 : vector<8x32xf32>
    %189 = arith.mulf %183, %188 : vector<8x32xf32>
    %190 = vector.extract_strided_slice %7 {offsets = [40, 0], sizes = [8, 128], strides = [1, 1]} : vector<64x128xf32> to vector<8x128xf32>
    %cst_44 = arith.constant dense<0.000000e+00> : vector<8x128xf32>
    %191 = tpu.matmul %189, %8, %cst_44 {dimension_numbers = #tpu.dot_dimension_numbers<[1], [0], [0], [1], [0, 0, 1, 1], [], []>} : vector<8x32xf32>, vector<32x128xf32>, vector<8x128xf32> -> vector<8x128xf32>
    %192 = arith.addf %190, %191 : vector<8x128xf32>
    %cst_45 = arith.constant dense<0.000000e+00> : vector<8x128xf32>
    %193 = tpu.matmul %189, %9, %cst_45 {dimension_numbers = #tpu.dot_dimension_numbers<[1], [0], [0], [1], [0, 0, 1, 1], [], []>} : vector<8x32xf32>, vector<32x128xf32>, vector<8x128xf32> -> vector<8x128xf32>
    %cst_46 = arith.constant dense<0.000000e+00> : vector<8x128xf32>
    %194 = tpu.matmul %174, %10, %cst_46 {dimension_numbers = #tpu.dot_dimension_numbers<[1], [0], [0], [1], [0, 0, 1, 1], [], []>} : vector<8x32xf32>, vector<32x128xf32>, vector<8x128xf32> -> vector<8x128xf32>
    %195 = arith.addf %193, %194 : vector<8x128xf32>
    %196 = vector.broadcast %11 : vector<1x128xf32> to vector<8x128xf32>
    %197 = arith.addf %195, %196 : vector<8x128xf32>
    %198 = arith.negf %197 : vector<8x128xf32>
    %199 = math.exp %198 : vector<8x128xf32>
    %cst_47 = arith.constant 1.000000e+00 : f32
    %200 = vector.broadcast %cst_47 : f32 to vector<8x128xf32>
    %201 = arith.addf %200, %199 : vector<8x128xf32>
    %202 = arith.divf %200, %201 : vector<8x128xf32>
    %203 = math.tanh %197 : vector<8x128xf32>
    %204 = vector.extract_strided_slice %202 {offsets = [0, 0], sizes = [8, 32], strides = [1, 1]} : vector<8x128xf32> to vector<8x32xf32>
    %205 = vector.extract_strided_slice %202 {offsets = [0, 32], sizes = [8, 32], strides = [1, 1]} : vector<8x128xf32> to vector<8x32xf32>
    %206 = vector.extract_strided_slice %202 {offsets = [0, 96], sizes = [8, 32], strides = [1, 1]} : vector<8x128xf32> to vector<8x32xf32>
    %207 = vector.extract_strided_slice %203 {offsets = [0, 64], sizes = [8, 32], strides = [1, 1]} : vector<8x128xf32> to vector<8x32xf32>
    %208 = arith.mulf %205, %172 : vector<8x32xf32>
    %209 = arith.mulf %204, %207 : vector<8x32xf32>
    %210 = arith.addf %208, %209 : vector<8x32xf32>
    %211 = math.tanh %210 : vector<8x32xf32>
    %212 = arith.mulf %206, %211 : vector<8x32xf32>
    %213 = arith.negf %192 : vector<8x128xf32>
    %214 = math.exp %213 : vector<8x128xf32>
    %cst_48 = arith.constant 1.000000e+00 : f32
    %215 = vector.broadcast %cst_48 : f32 to vector<8x128xf32>
    %216 = arith.addf %215, %214 : vector<8x128xf32>
    %217 = arith.divf %215, %216 : vector<8x128xf32>
    %218 = math.tanh %192 : vector<8x128xf32>
    %219 = vector.extract_strided_slice %217 {offsets = [0, 0], sizes = [8, 32], strides = [1, 1]} : vector<8x128xf32> to vector<8x32xf32>
    %220 = vector.extract_strided_slice %217 {offsets = [0, 32], sizes = [8, 32], strides = [1, 1]} : vector<8x128xf32> to vector<8x32xf32>
    %221 = vector.extract_strided_slice %217 {offsets = [0, 96], sizes = [8, 32], strides = [1, 1]} : vector<8x128xf32> to vector<8x32xf32>
    %222 = vector.extract_strided_slice %218 {offsets = [0, 64], sizes = [8, 32], strides = [1, 1]} : vector<8x128xf32> to vector<8x32xf32>
    %223 = arith.mulf %220, %187 : vector<8x32xf32>
    %224 = arith.mulf %219, %222 : vector<8x32xf32>
    %225 = arith.addf %223, %224 : vector<8x32xf32>
    %226 = math.tanh %225 : vector<8x32xf32>
    %227 = arith.mulf %221, %226 : vector<8x32xf32>
    %228 = vector.extract_strided_slice %7 {offsets = [48, 0], sizes = [8, 128], strides = [1, 1]} : vector<64x128xf32> to vector<8x128xf32>
    %cst_49 = arith.constant dense<0.000000e+00> : vector<8x128xf32>
    %229 = tpu.matmul %227, %8, %cst_49 {dimension_numbers = #tpu.dot_dimension_numbers<[1], [0], [0], [1], [0, 0, 1, 1], [], []>} : vector<8x32xf32>, vector<32x128xf32>, vector<8x128xf32> -> vector<8x128xf32>
    %230 = arith.addf %228, %229 : vector<8x128xf32>
    %cst_50 = arith.constant dense<0.000000e+00> : vector<8x128xf32>
    %231 = tpu.matmul %227, %9, %cst_50 {dimension_numbers = #tpu.dot_dimension_numbers<[1], [0], [0], [1], [0, 0, 1, 1], [], []>} : vector<8x32xf32>, vector<32x128xf32>, vector<8x128xf32> -> vector<8x128xf32>
    %cst_51 = arith.constant dense<0.000000e+00> : vector<8x128xf32>
    %232 = tpu.matmul %212, %10, %cst_51 {dimension_numbers = #tpu.dot_dimension_numbers<[1], [0], [0], [1], [0, 0, 1, 1], [], []>} : vector<8x32xf32>, vector<32x128xf32>, vector<8x128xf32> -> vector<8x128xf32>
    %233 = arith.addf %231, %232 : vector<8x128xf32>
    %234 = vector.broadcast %11 : vector<1x128xf32> to vector<8x128xf32>
    %235 = arith.addf %233, %234 : vector<8x128xf32>
    %236 = arith.negf %235 : vector<8x128xf32>
    %237 = math.exp %236 : vector<8x128xf32>
    %cst_52 = arith.constant 1.000000e+00 : f32
    %238 = vector.broadcast %cst_52 : f32 to vector<8x128xf32>
    %239 = arith.addf %238, %237 : vector<8x128xf32>
    %240 = arith.divf %238, %239 : vector<8x128xf32>
    %241 = math.tanh %235 : vector<8x128xf32>
    %242 = vector.extract_strided_slice %240 {offsets = [0, 0], sizes = [8, 32], strides = [1, 1]} : vector<8x128xf32> to vector<8x32xf32>
    %243 = vector.extract_strided_slice %240 {offsets = [0, 32], sizes = [8, 32], strides = [1, 1]} : vector<8x128xf32> to vector<8x32xf32>
    %244 = vector.extract_strided_slice %240 {offsets = [0, 96], sizes = [8, 32], strides = [1, 1]} : vector<8x128xf32> to vector<8x32xf32>
    %245 = vector.extract_strided_slice %241 {offsets = [0, 64], sizes = [8, 32], strides = [1, 1]} : vector<8x128xf32> to vector<8x32xf32>
    %246 = arith.mulf %243, %210 : vector<8x32xf32>
    %247 = arith.mulf %242, %245 : vector<8x32xf32>
    %248 = arith.addf %246, %247 : vector<8x32xf32>
    %249 = math.tanh %248 : vector<8x32xf32>
    %250 = arith.mulf %244, %249 : vector<8x32xf32>
    %251 = arith.negf %230 : vector<8x128xf32>
    %252 = math.exp %251 : vector<8x128xf32>
    %cst_53 = arith.constant 1.000000e+00 : f32
    %253 = vector.broadcast %cst_53 : f32 to vector<8x128xf32>
    %254 = arith.addf %253, %252 : vector<8x128xf32>
    %255 = arith.divf %253, %254 : vector<8x128xf32>
    %256 = math.tanh %230 : vector<8x128xf32>
    %257 = vector.extract_strided_slice %255 {offsets = [0, 0], sizes = [8, 32], strides = [1, 1]} : vector<8x128xf32> to vector<8x32xf32>
    %258 = vector.extract_strided_slice %255 {offsets = [0, 32], sizes = [8, 32], strides = [1, 1]} : vector<8x128xf32> to vector<8x32xf32>
    %259 = vector.extract_strided_slice %255 {offsets = [0, 96], sizes = [8, 32], strides = [1, 1]} : vector<8x128xf32> to vector<8x32xf32>
    %260 = vector.extract_strided_slice %256 {offsets = [0, 64], sizes = [8, 32], strides = [1, 1]} : vector<8x128xf32> to vector<8x32xf32>
    %261 = arith.mulf %258, %225 : vector<8x32xf32>
    %262 = arith.mulf %257, %260 : vector<8x32xf32>
    %263 = arith.addf %261, %262 : vector<8x32xf32>
    %264 = math.tanh %263 : vector<8x32xf32>
    %265 = arith.mulf %259, %264 : vector<8x32xf32>
    %266 = vector.extract_strided_slice %7 {offsets = [56, 0], sizes = [8, 128], strides = [1, 1]} : vector<64x128xf32> to vector<8x128xf32>
    %cst_54 = arith.constant dense<0.000000e+00> : vector<8x128xf32>
    %267 = tpu.matmul %265, %8, %cst_54 {dimension_numbers = #tpu.dot_dimension_numbers<[1], [0], [0], [1], [0, 0, 1, 1], [], []>} : vector<8x32xf32>, vector<32x128xf32>, vector<8x128xf32> -> vector<8x128xf32>
    %268 = arith.addf %266, %267 : vector<8x128xf32>
    %cst_55 = arith.constant dense<0.000000e+00> : vector<8x128xf32>
    %269 = tpu.matmul %265, %9, %cst_55 {dimension_numbers = #tpu.dot_dimension_numbers<[1], [0], [0], [1], [0, 0, 1, 1], [], []>} : vector<8x32xf32>, vector<32x128xf32>, vector<8x128xf32> -> vector<8x128xf32>
    %cst_56 = arith.constant dense<0.000000e+00> : vector<8x128xf32>
    %270 = tpu.matmul %250, %10, %cst_56 {dimension_numbers = #tpu.dot_dimension_numbers<[1], [0], [0], [1], [0, 0, 1, 1], [], []>} : vector<8x32xf32>, vector<32x128xf32>, vector<8x128xf32> -> vector<8x128xf32>
    %271 = arith.addf %269, %270 : vector<8x128xf32>
    %272 = vector.broadcast %11 : vector<1x128xf32> to vector<8x128xf32>
    %273 = arith.addf %271, %272 : vector<8x128xf32>
    %274 = arith.negf %273 : vector<8x128xf32>
    %275 = math.exp %274 : vector<8x128xf32>
    %cst_57 = arith.constant 1.000000e+00 : f32
    %276 = vector.broadcast %cst_57 : f32 to vector<8x128xf32>
    %277 = arith.addf %276, %275 : vector<8x128xf32>
    %278 = arith.divf %276, %277 : vector<8x128xf32>
    %279 = math.tanh %273 : vector<8x128xf32>
    %280 = vector.extract_strided_slice %278 {offsets = [0, 0], sizes = [8, 32], strides = [1, 1]} : vector<8x128xf32> to vector<8x32xf32>
    %281 = vector.extract_strided_slice %278 {offsets = [0, 32], sizes = [8, 32], strides = [1, 1]} : vector<8x128xf32> to vector<8x32xf32>
    %282 = vector.extract_strided_slice %278 {offsets = [0, 96], sizes = [8, 32], strides = [1, 1]} : vector<8x128xf32> to vector<8x32xf32>
    %283 = vector.extract_strided_slice %279 {offsets = [0, 64], sizes = [8, 32], strides = [1, 1]} : vector<8x128xf32> to vector<8x32xf32>
    %284 = arith.mulf %281, %248 : vector<8x32xf32>
    %285 = arith.mulf %280, %283 : vector<8x32xf32>
    %286 = arith.addf %284, %285 : vector<8x32xf32>
    %287 = math.tanh %286 : vector<8x32xf32>
    %288 = arith.mulf %282, %287 : vector<8x32xf32>
    %289 = arith.negf %268 : vector<8x128xf32>
    %290 = math.exp %289 : vector<8x128xf32>
    %cst_58 = arith.constant 1.000000e+00 : f32
    %291 = vector.broadcast %cst_58 : f32 to vector<8x128xf32>
    %292 = arith.addf %291, %290 : vector<8x128xf32>
    %293 = arith.divf %291, %292 : vector<8x128xf32>
    %294 = math.tanh %268 : vector<8x128xf32>
    %295 = vector.extract_strided_slice %293 {offsets = [0, 0], sizes = [8, 32], strides = [1, 1]} : vector<8x128xf32> to vector<8x32xf32>
    %296 = vector.extract_strided_slice %293 {offsets = [0, 32], sizes = [8, 32], strides = [1, 1]} : vector<8x128xf32> to vector<8x32xf32>
    %297 = vector.extract_strided_slice %293 {offsets = [0, 96], sizes = [8, 32], strides = [1, 1]} : vector<8x128xf32> to vector<8x32xf32>
    %298 = vector.extract_strided_slice %294 {offsets = [0, 64], sizes = [8, 32], strides = [1, 1]} : vector<8x128xf32> to vector<8x32xf32>
    %299 = arith.mulf %296, %263 : vector<8x32xf32>
    %300 = arith.mulf %295, %298 : vector<8x32xf32>
    %301 = arith.addf %299, %300 : vector<8x32xf32>
    %302 = math.tanh %301 : vector<8x32xf32>
    %303 = arith.mulf %297, %302 : vector<8x32xf32>
    %cst_59 = arith.constant dense<0.000000e+00> : vector<8x128xf32>
    %304 = tpu.matmul %303, %9, %cst_59 {dimension_numbers = #tpu.dot_dimension_numbers<[1], [0], [0], [1], [0, 0, 1, 1], [], []>} : vector<8x32xf32>, vector<32x128xf32>, vector<8x128xf32> -> vector<8x128xf32>
    %cst_60 = arith.constant dense<0.000000e+00> : vector<8x128xf32>
    %305 = tpu.matmul %288, %10, %cst_60 {dimension_numbers = #tpu.dot_dimension_numbers<[1], [0], [0], [1], [0, 0, 1, 1], [], []>} : vector<8x32xf32>, vector<32x128xf32>, vector<8x128xf32> -> vector<8x128xf32>
    %306 = arith.addf %304, %305 : vector<8x128xf32>
    %307 = vector.broadcast %11 : vector<1x128xf32> to vector<8x128xf32>
    %308 = arith.addf %306, %307 : vector<8x128xf32>
    %309 = arith.negf %308 : vector<8x128xf32>
    %310 = math.exp %309 : vector<8x128xf32>
    %cst_61 = arith.constant 1.000000e+00 : f32
    %311 = vector.broadcast %cst_61 : f32 to vector<8x128xf32>
    %312 = arith.addf %311, %310 : vector<8x128xf32>
    %313 = arith.divf %311, %312 : vector<8x128xf32>
    %314 = math.tanh %308 : vector<8x128xf32>
    %315 = vector.extract_strided_slice %313 {offsets = [0, 0], sizes = [8, 32], strides = [1, 1]} : vector<8x128xf32> to vector<8x32xf32>
    %316 = vector.extract_strided_slice %313 {offsets = [0, 32], sizes = [8, 32], strides = [1, 1]} : vector<8x128xf32> to vector<8x32xf32>
    %317 = vector.extract_strided_slice %313 {offsets = [0, 96], sizes = [8, 32], strides = [1, 1]} : vector<8x128xf32> to vector<8x32xf32>
    %318 = vector.extract_strided_slice %314 {offsets = [0, 64], sizes = [8, 32], strides = [1, 1]} : vector<8x128xf32> to vector<8x32xf32>
    %319 = arith.mulf %316, %286 : vector<8x32xf32>
    %320 = arith.mulf %315, %318 : vector<8x32xf32>
    %321 = arith.addf %319, %320 : vector<8x32xf32>
    %322 = math.tanh %321 : vector<8x32xf32>
    %323 = arith.mulf %317, %322 : vector<8x32xf32>
    %c0_62 = arith.constant 0 : index
    %c0_63 = arith.constant 0 : index
    %c0_64 = arith.constant 0 : index
    %324 = vector.load %arg11[%c0_62, %c0_63, %c0_64] : memref<2x8x32xf32, #tpu.memory_space<vmem>>, vector<1x8x32xf32>
    %325 = vector.shape_cast %324 : vector<1x8x32xf32> to vector<8x32xf32>
    %326 = vector.shape_cast %303 : vector<8x32xf32> to vector<1x8x32xf32>
    tpu.vector_store %arg11[%c0_62, %c0_63, %c0_64], %326 {strides = array<i32>} : memref<2x8x32xf32, #tpu.memory_space<vmem>>, vector<1x8x32xf32>,
    %c0_65 = arith.constant 0 : index
    %c0_66 = arith.constant 0 : index
    %c0_67 = arith.constant 0 : index
    %327 = vector.load %arg12[%c0_65, %c0_66, %c0_67] : memref<2x8x32xf32, #tpu.memory_space<vmem>>, vector<1x8x32xf32>
    %328 = vector.shape_cast %327 : vector<1x8x32xf32> to vector<8x32xf32>
    %329 = vector.shape_cast %301 : vector<8x32xf32> to vector<1x8x32xf32>
    tpu.vector_store %arg12[%c0_65, %c0_66, %c0_67], %329 {strides = array<i32>} : memref<2x8x32xf32, #tpu.memory_space<vmem>>, vector<1x8x32xf32>,
    %c1_68 = arith.constant 1 : index
    %c0_69 = arith.constant 0 : index
    %c0_70 = arith.constant 0 : index
    %330 = vector.load %arg11[%c1_68, %c0_69, %c0_70] : memref<2x8x32xf32, #tpu.memory_space<vmem>>, vector<1x8x32xf32>
    %331 = vector.shape_cast %330 : vector<1x8x32xf32> to vector<8x32xf32>
    %332 = vector.shape_cast %323 : vector<8x32xf32> to vector<1x8x32xf32>
    tpu.vector_store %arg11[%c1_68, %c0_69, %c0_70], %332 {strides = array<i32>} : memref<2x8x32xf32, #tpu.memory_space<vmem>>, vector<1x8x32xf32>,
    %c1_71 = arith.constant 1 : index
    %c0_72 = arith.constant 0 : index
    %c0_73 = arith.constant 0 : index
    %333 = vector.load %arg12[%c1_71, %c0_72, %c0_73] : memref<2x8x32xf32, #tpu.memory_space<vmem>>, vector<1x8x32xf32>
    %334 = vector.shape_cast %333 : vector<1x8x32xf32> to vector<8x32xf32>
    %335 = vector.shape_cast %321 : vector<8x32xf32> to vector<1x8x32xf32>
    tpu.vector_store %arg12[%c1_71, %c0_72, %c0_73], %335 {strides = array<i32>} : memref<2x8x32xf32, #tpu.memory_space<vmem>>, vector<1x8x32xf32>,
    %c0_74 = arith.constant 0 : index
    %c0_75 = arith.constant 0 : index
    %336 = vector.load %arg6[%c0_74, %c0_75] : memref<32x5xf32, #tpu.memory_space<vmem>>, vector<32x5xf32>
    %cst_76 = arith.constant dense<0.000000e+00> : vector<8x5xf32>
    %337 = tpu.matmul %323, %336, %cst_76 {dimension_numbers = #tpu.dot_dimension_numbers<[1], [0], [0], [1], [0, 0, 1, 1], [], []>} : vector<8x32xf32>, vector<32x5xf32>, vector<8x5xf32> -> vector<8x5xf32>
    %c0_77 = arith.constant 0 : index
    %c0_78 = arith.constant 0 : index
    %338 = vector.load %arg7[%c0_77, %c0_78] : memref<1x5xf32, #tpu.memory_space<vmem>>, vector<1x5xf32>
    %339 = vector.broadcast %338 : vector<1x5xf32> to vector<8x5xf32>
    %340 = arith.addf %337, %339 : vector<8x5xf32>
    %cst_79 = arith.constant dense<0xFF800000> : vector<8xf32>
    %341 = vector.multi_reduction <maximumf>, %340, %cst_79 [1] : vector<8x5xf32> to vector<8xf32>
    %342 = vector.shape_cast %341 : vector<8xf32> to vector<8x1xf32>
    %343 = vector.broadcast %342 : vector<8x1xf32> to vector<8x5xf32>
    %344 = arith.subf %340, %343 : vector<8x5xf32>
    %345 = math.exp %344 : vector<8x5xf32>
    %cst_80 = arith.constant dense<0.000000e+00> : vector<8xf32>
    %346 = vector.multi_reduction <add>, %345, %cst_80 [1] : vector<8x5xf32> to vector<8xf32>
    %347 = vector.shape_cast %346 : vector<8xf32> to vector<8x1xf32>
    %348 = math.log %347 : vector<8x1xf32>
    %349 = vector.broadcast %348 : vector<8x1xf32> to vector<8x5xf32>
    %350 = arith.subf %344, %349 : vector<8x5xf32>
    %c0_81 = arith.constant 0 : index
    %c0_82 = arith.constant 0 : index
    %351 = vector.load %arg10[%c0_81, %c0_82] : memref<8x5xf32, #tpu.memory_space<vmem>>, vector<8x5xf32>
    tpu.vector_store %arg10[%c0_81, %c0_82], %350 {strides = array<i32>} : memref<8x5xf32, #tpu.memory_space<vmem>>, vector<8x5xf32>,
    return
  }
}

</mosaic_0001>

<bundles_post_ra>
// kernel: sentiment_rnn_forward.1
= control target key start
LH: loop header
LB: loop body
LE: loop exit
PB: predicated region body
PF: predicated region fallthrough
CT: control target
= control target key end

     0   :  { %18 = vsyncpa [#allocation3], 0  ;;  %v3471_v2 = vmov 0   ;;  %v3472_v7 = vmov 0.0|0.0   ;;  %s4066_s0 = inlined_call_operand.vmem [shape: s32[64,1], index: 0, kind: input, shape index: {}]   ;;  %s4067_s1 = inlined_call_operand.vmem [shape: f32[56,128], index: 1, kind: input, shape index: {}]   ;;  %s4068_s2 = inlined_call_operand.vmem [shape: f32[32,128], index: 2, kind: input, shape index: {}]   ;;  %s4069_s3 = inlined_call_operand.vmem [shape: f32[32,128], index: 3, kind: input, shape index: {}]   ;;  %s4070_s4 = inlined_call_operand.vmem [shape: f32[32,128], index: 4, kind: input, shape index: {}]   ;;  %s4071_s5 = inlined_call_operand.vmem [shape: f32[1,128], index: 5, kind: input, shape index: {}]   ;;  %s4072_s6 = inlined_call_operand.vmem [shape: f32[32,5], index: 6, kind: input, shape index: {}]   ;;  %s4073_s7 = inlined_call_operand.vmem [shape: f32[1,5], index: 7, kind: input, shape index: {}]   ;;  %s4074_s8 = inlined_call_operand.vmem [shape: f32[2,8,32], index: 8, kind: input, shape index: {}]   ;;  %s4075_s9 = inlined_call_operand.vmem [shape: f32[2,8,32], index: 9, kind: input, shape index: {}]   ;;  %s4076_s10 = inlined_call_operand.hbm [shape: f32[8,5], index: 10, kind: output, shape index: {0}]   ;;  %s4077_s11 = inlined_call_operand.hbm [shape: f32[2,8,32], index: 11, kind: output, shape index: {1}]   ;;  %s4078_s12 = inlined_call_operand.hbm [shape: f32[2,8,32], index: 12, kind: output, shape index: {2}]  }
   0x1   :  { %v40_v0 = vld [vmem:[%s4066_s0] sm:$0xff]  ;;  %3267 = vset.pattern.permute.xlu0 %v3471_v2  ;;  %v41_v3 = vld [vmem:[%s4066_s0 + $0x8] sm:$0xff]  ;;  %v100_v5 = vld [vmem:[%s4067_s1 + $0x10] sm:$0xff]  ;;  %3105 = vmatprep.subr.bf16.mxu1 %v3472_v7 }
   0x2   :  { %v98_v1 = vld [vmem:[%s4067_s1] sm:$0xff]  ;;  %v99_v4 = vld [vmem:[%s4067_s1 + $0x8] sm:$0xff]  ;;  %v101_v6 = vld [vmem:[%s4067_s1 + $0x18] sm:$0xff]  ;;  %51 = vperm.xlu0 %3267, %v40_v0   ;;  %3268 = vset.pattern.permute.xlu1 %v3471_v2 }
   0x3   :  { %v3093_v8 = vpack.c.bf16 %v99_v4, %v98_v1  ;;  %v3097_v9 = vpack.c.bf16 %v101_v6, %v100_v5  ;;  %v235_v10 = vld [vmem:[%s4068_s2] sm:$0xff]  ;;  %v236_v11 = vld [vmem:[%s4068_s2 + $0x8] sm:$0xff]  ;;  %v237_v15 = vld [vmem:[%s4068_s2 + $0x10] sm:$0xff] }
   0x4   :  { %v102_v12 = vld [vmem:[%s4067_s1 + $0x20] sm:$0xff]  ;;  %v3576_v13 = vpack.c.bf16 %v236_v11, %v235_v10  ;;  %v103_v14 = vld [vmem:[%s4067_s1 + $0x28] sm:$0xff]  ;;  %v238_v16 = vld [vmem:[%s4068_s2 + $0x18] sm:$0xff] }
   0x5   :  { %3094 = vmatprep.subr.bf16.mxu0 %v3093_v8 }
   0x6   :  { %19 = vsyncpa [#allocation5], 0  ;;  %3096 = vmatpush3.bf16.msra.mxu0 %v3093_v8  ;;  %3107 = vmatpush3.bf16.msra.mxu1 %v3576_v13  ;;  %v3588_v17 = vpack.c.bf16 %v238_v16, %v237_v15  ;;  %v3101_v18 = vpack.c.bf16 %v103_v14, %v102_v12  ;;  %vm3473_vm0 = vmmov 0   ;;  %v3474_v19 = vmov 0.0   ;;  %v248_v20 = vld [vmem:[%s4074_s8] sm:$0xff]  ;;  %v104_v21 = vld [vmem:[%s4067_s1 + $0x30] sm:$0xff] }
   0x7   :  { %54 = vperm.xlu0 %3267, %v41_v3   ;;  %3098 = vmatprep.subr.bf16.mxu0 %v3097_v9  ;;  %vm254_vm1 = vcmask 261120   ;;  %v48_v22 = vlaneseq  ;;  %vm105_vm2 = vcmask 457728   ;;  %s3475_s1 = smov 64   ;;  %v249_v34 = vld [vmem:[%s4075_s9] sm:$0xff]  ;;  %s3476_s14 = smov 32   ;;  %v42_v41 = vld [vmem:[%s4066_s0 + $0x10] sm:$0xff] }
   0x8   :  { %3108 = vmatprep.subr.bf16.mxu1 %v3472_v7  ;;  %2826 = vmatprep.mubr.msk.f32.mxu1 %vm3473_vm0, %v3474_v19  ;;  %v44_v42 = vld [vmem:[%s4066_s0 + $0x20] sm:$0xff]  ;;  %v46_v43 = vld [vmem:[%s4066_s0 + $0x30] sm:$0xff]  ;;  %v43_v49 = vld [vmem:[%s4066_s0 + $0x18] sm:$0xff]  ;;  %vm2532_vm11 = vcmask 39936  }
   0x9   :  { %v3609_v23 = vand.u32 127, %v48_v22  ;;  %v45_v52 = vld [vmem:[%s4066_s0 + $0x28] sm:$0xff]  ;;  %v47_v53 = vld [vmem:[%s4066_s0 + $0x38] sm:$0xff]  ;;  %v239_v54 = vld [vmem:[%s4069_s3] sm:$0xff] }
   0xa   :  { %3100 = vmatpush3.bf16.msra.mxu0 %v3097_v9  ;;  %3110 = vmatpush3.bf16.msra.mxu1 %v3588_v17  ;;  %v240_v55 = vld [vmem:[%s4069_s3 + $0x8] sm:$0xff]  ;;  %v241_v57 = vld [vmem:[%s4069_s3 + $0x10] sm:$0xff]  ;;  %v242_v58 = vld [vmem:[%s4069_s3 + $0x18] sm:$0xff] }
   0xb   :  { %3102 = vmatprep.subr.bf16.mxu0 %v3101_v18  ;;  %3111 = vmatprep.subr.bf16.mxu1 %v3472_v7  ;;  %v3656_v56 = vpack.c.bf16 %v240_v55, %v239_v54  ;;  %v3666_v59 = vpack.c.bf16 %v242_v58, %v241_v57  ;;  %v243_v9 = vld [vmem:[%s4070_s4] sm:$0xff]  ;;  %v244_v10 = vld [vmem:[%s4070_s4 + $0x8] sm:$0xff]  ;;  %v245_v12 = vld [vmem:[%s4070_s4 + $0x10] sm:$0xff] }
   0xc   :  { %v3694_v11 = vpack.c.bf16 %v244_v10, %v243_v9  ;;  %v246_v14 = vld [vmem:[%s4070_s4 + $0x18] sm:$0xff] }
   0xd   :  { %2827 = vmatmul.mubr.msk.f32.vlgmr.msra.gmra.mrb[0].mxu1 %vm254_vm1, %v248_v20  ;;  %v3705_v16 = vpack.c.bf16 %v246_v14, %v245_v12 }
   0xe   :  { %3104 = vmatpush3.bf16.msra.mxu0 %v3101_v18  ;;  %3113 = vmatpush3.bf16.msra.mxu1 %v3576_v13  ;;  %v2607_v18 = vld [vmem:[%s4074_s8 + $0x8] sm:$0xff] }
   0xf   :  { %2804 = vmatprep.subr.mxu0 %v104_v21  ;;  %3114 = vmatprep.subr.bf16.mxu1 %v3472_v7 }
  0x10   :  { %2837 = vmatprep.mubr.msk.f32.mxu1 %vm3473_vm0, %v3474_v19 }
  0x12   :  { %2805 = vmatpush3.msra.mxu0 %v104_v21  ;;  %3116 = vmatpush3.bf16.msra.mxu1 %v3588_v17 }
  0x13   :  { %3123 = vmatprep.subr.bf16.mxu0 %v3472_v7  ;;  %3117 = vmatprep.subr.bf16.mxu1 %v3472_v7 }
  0x81   :  { %v52_v24 = vpop.permute.xlu0 %51 }
  0x82   :  { %vm74_vm3 = vcmp.eq.s32.totalorder %v52_v24, %v3609_v23 }
  0x83   :  { %v2591_v25 = vsel %vm74_vm3, 1.0, %v3474_v19 }
  0x84   :  { %2806 = vmatprep.mubr.msk.f32.mxu0 %vm105_vm2, %v2591_v25 }
  0x86   :  { %v55_v26 = vpop.permute.xlu0 %54 }
  0x87   :  { %vm75_vm4 = vcmp.eq.s32.totalorder %v55_v26, %v3609_v23 }
  0x88   :  { %v2592_v27 = vsel %vm75_vm4, 1.0, %v3474_v19 }
  0x89   :  { %2807 = vmatmul.mubr.msk.f32.vlgmr.msra.gmra.mrb[0].mxu0 %vm105_vm2, %v2592_v27 }
  0x8a   :  { %3125 = vmatpush3.bf16.msra.mxu0 %v3656_v56 }
  0x8b   :  { %3126 = vmatprep.subr.bf16.mxu0 %v3472_v7 }
  0x8e   :  { %3128 = vmatpush3.bf16.msra.mxu0 %v3666_v59 }
  0x8f   :  { %3135 = vmatprep.subr.bf16.mxu0 %v3472_v7 }
  0xe0   :  { %v324_v28 = vpop.f32.mrb[0].mxu1 }
  0xe1   :  { %v2828_v29 = vpop.f32.mrb[1].mxu1 }
 0x15c   :  { %v3617_v30 = vpop.f32.mrb[0].mxu0 }
 0x15d   :  { %v196_v31 = vpop.f32.mrb[1].mxu0 }
 0x15e   :  { %v328_v32 = vadd.f32 %v324_v28, %v196_v31 }
 0x160   :  { %3269 = vtanh.f32 %v328_v32  ;;  %v2610_v35 = vmul.f32 -1.442695, %v328_v32  ;;  %v3744_v32 = vld [vmem:[%s4071_s5] ss:$0 sm:$0xff] }
 0x162   :  { %3271 = vpow2.f32 %v2610_v35 }
 0x16a   :  { %v3270_v33 = vpop.eup %3269 }
 0x16b   :  { %342 = vrot.lane.b32.xlu1 %v3270_v33, %s3475_s1 }
 0x16c   :  { %v3272_v36 = vpop.eup %3271 }
 0x16d   :  { %v332_v37 = vadd.f32 1.0, %v3272_v36 }
 0x16f   :  { %337 = vrot.lane.b32.xlu1 %v249_v34, %s3476_s14  ;;  %3273 = vrcp.f32 %v332_v37 }
 0x179   :  { %v3274_v38 = vpop.eup %3273 }
 0x1dd   :  { %v343_v39 = vpop.permute.xlu1 %342 }
 0x1de   :  { %v345_v40 = vmul.f32 %v3274_v38, %v343_v39 }
 0x1e0   :  { %347 = vrot.lane.b32.xlu0 %v345_v40, %s3476_s14 }
 0x1e1   :  { %v338_v44 = vpop.permute.xlu1 %337 }
 0x1e2   :  { %v340_v45 = vmul.f32 %v3274_v38, %v338_v44 }
 0x1e4   :  { %57 = vperm.xlu0 %3267, %v42_v41  }
 0x1e8   :  { %63 = vperm.xlu0 %3267, %v44_v42  }
 0x1ec   :  { %69 = vperm.xlu0 %3267, %v46_v43  }
 0x252   :  { %v348_v46 = vpop.permute.xlu0 %347 }
 0x253   :  { %v3634_v47 = vadd.f32 %v348_v46, %v340_v45 }
 0x255   :  { %3275 = vtanh.f32 %v3634_v47 }
 0x25f   :  { %v3276_v48 = vpop.eup %3275 }
 0x260   :  { %353 = vrot.lane.b32.xlu1 %v3276_v48, %s3475_s1 }
 0x263   :  { %v58_v50 = vpop.permute.xlu0 %57 }
 0x264   :  { %vm76_vm5 = vcmp.eq.s32.totalorder %v58_v50, %v3609_v23  ;;  %60 = vperm.xlu1 %3268, %v43_v49  }
 0x265   :  { %v2593_v51 = vsel %vm76_vm5, 1.0, %v3474_v19 }
 0x266   :  { %2809 = vmatprep.mubr.msk.f32.mxu0 %vm105_vm2, %v2593_v51 }
 0x267   :  { %v64_v62 = vpop.permute.xlu0 %63 }
 0x268   :  { %66 = vperm.xlu1 %3268, %v45_v52   ;;  %vm78_vm6 = vcmp.eq.s32.totalorder %v64_v62, %v3609_v23 }
 0x269   :  { %v2595_v2 = vsel %vm78_vm6, 1.0, %v3474_v19 }
 0x26b   :  { %v70_v0 = vpop.permute.xlu0 %69 }
 0x26c   :  { %72 = vperm.xlu1 %3268, %v47_v53   ;;  %vm80_vm8 = vcmp.eq.s32.totalorder %v70_v0, %v3609_v23 }
 0x26d   :  { %v2597_v5 = vsel %vm80_vm8, 1.0, %v3474_v19 }
 0x2d2   :  { %v354_v60 = vpop.permute.xlu1 %353 }
 0x2d3   :  { %v356_v61 = vmul.f32 %v3274_v38, %v354_v60 }
 0x2d5   :  { %358 = vrot.lane.b32.xlu0 %v356_v61, %s3476_s14 }
 0x2e3   :  { %v61_v63 = vpop.permute.xlu1 %60 }
 0x2e4   :  { %vm77_vm7 = vcmp.eq.s32.totalorder %v61_v63, %v3609_v23 }
 0x2e5   :  { %v2594_v1 = vsel %vm77_vm7, 1.0, %v3474_v19 }
 0x2e6   :  { %2810 = vmatmul.mubr.msk.f32.gmra.mrb[2].mxu0 %vm105_vm2, %v2594_v1 }
 0x2e7   :  { %2812 = vmatprep.mubr.msk.f32.mxu0 %vm105_vm2, %v2595_v2  ;;  %v67_v3 = vpop.permute.xlu1 %66 }
 0x2e8   :  { %vm79_vm9 = vcmp.eq.s32.totalorder %v67_v3, %v3609_v23 }
 0x2e9   :  { %v2596_v4 = vsel %vm79_vm9, 1.0, %v3474_v19 }
 0x2ea   :  { %2813 = vmatmul.mubr.msk.f32.gmra.mrb[4].mxu0 %vm105_vm2, %v2596_v4 }
 0x2eb   :  { %2815 = vmatprep.mubr.msk.f32.mxu0 %vm105_vm2, %v2597_v5  ;;  %v73_v6 = vpop.permute.xlu1 %72 }
 0x2ec   :  { %vm81_vm10 = vcmp.eq.s32.totalorder %v73_v6, %v3609_v23 }
 0x2ed   :  { %v2598_v8 = vsel %vm81_vm10, 1.0, %v3474_v19 }
 0x2ee   :  { %2816 = vmatmul.mubr.msk.f32.gmra.mrb[6].mxu0 %vm105_vm2, %v2598_v8 }
 0x2ef   :  { %2859 = vmatprep.mubr.msk.f32.mxu0 %vm3473_vm0, %v3474_v19 }
 0x347   :  { %v359_v15 = vpop.permute.xlu0 %358 }
 0x348   :  { %2838 = vmatmul.mubr.msk.f32.vlgmr.msra.gmra.mrb[2].mxu1 %vm254_vm1, %v359_v15  ;;  %2860 = vmatmul.mubr.msk.f32.vlgmr.msra.gmra.mrb[8].mxu0 %vm254_vm1, %v359_v15 }
 0x349   :  { %3119 = vmatpush3.bf16.msra.mxu1 %v3694_v11  ;;  %2848 = vmatprep.mubr.msk.f32.mxu1 %vm3473_vm0, %v3474_v19 }
 0x34a   :  { %3120 = vmatprep.subr.bf16.mxu1 %v3472_v7  ;;  %3137 = vmatpush3.bf16.msra.mxu0 %v3694_v11 }
 0x34b   :  { %3138 = vmatprep.subr.bf16.mxu0 %v3472_v7  ;;  %2881 = vmatprep.mubr.msk.f32.mxu0 %vm3473_vm0, %v3474_v19 }
 0x34d   :  { %3122 = vmatpush3.bf16.msra.mxu1 %v3705_v16 }
 0x34e   :  { %3129 = vmatprep.subr.bf16.mxu1 %v3472_v7  ;;  %3140 = vmatpush3.bf16.msra.mxu0 %v3705_v16 }
 0x34f   :  { %3147 = vmatprep.subr.bf16.mxu0 %v3472_v7 }
 0x350   :  { %2849 = vmatmul.mubr.msk.f32.vlgmr.msra.gmra.mrb[4].mxu1 %vm254_vm1, %v2607_v18 }
 0x351   :  { %3131 = vmatpush3.bf16.msra.mxu1 %v3576_v13  ;;  %2870 = vmatprep.mubr.msk.f32.mxu1 %vm3473_vm0, %v3474_v19 }
 0x352   :  { %3132 = vmatprep.subr.bf16.mxu1 %v3472_v7 }
 0x355   :  { %3134 = vmatpush3.bf16.msra.mxu1 %v3588_v17 }
 0x356   :  { %3141 = vmatprep.subr.bf16.mxu1 %v3472_v7 }
 0x3b9   :  { %v3728_v20 = vpop.f32.mrb[2].mxu0 }
 0x3ba   :  { %v3730_v21 = vpop.f32.mrb[3].mxu0 }
 0x3bd   :  { %v3732_v22 = vpop.f32.mrb[4].mxu0 }
 0x3be   :  { %v3734_v23 = vpop.f32.mrb[5].mxu0 }
 0x3c1   :  { %v3736_v24 = vpop.f32.mrb[6].mxu0 }
 0x3c2   :  { %v3738_v25 = vpop.f32.mrb[7].mxu0 }
 0x41b   :  { %v428_v26 = vpop.f32.mrb[2].mxu1  ;;  %v572_v27 = vpop.f32.mrb[8].mxu0 }
 0x41c   :  { %v432_v28 = vadd.f32 %v3617_v30, %v428_v26  ;;  %v2839_v29 = vpop.f32.mrb[3].mxu1  ;;  %v2861_v31 = vpop.f32.mrb[9].mxu0  ;;  %v2608_v30 = vld [vmem:[%s4075_s9 + $0x8] sm:$0xff] }
 0x41e   :  { %3277 = vtanh.f32 %v432_v28  ;;  %v2616_v39 = vmul.f32 -1.442695, %v432_v28 }
 0x423   :  { %v502_v33 = vpop.f32.mrb[4].mxu1 }
 0x424   :  { %v573_v34 = vadd.f32 %v572_v27, %v502_v33  ;;  %v2850_v35 = vpop.f32.mrb[5].mxu1 }
 0x426   :  { %v582_v36 = vadd.f32 %v3744_v32, %v573_v34 }
 0x428   :  { %v3278_v37 = vpop.eup %3277  ;;  %3279 = vtanh.f32 %v582_v36  ;;  %v2615_v40 = vmul.f32 -1.442695, %v582_v36 }
 0x429   :  { %620 = vrot.lane.b32.xlu1 %v3278_v37, %s3475_s1  ;;  %3281 = vpow2.f32 %v2616_v39 }
 0x42a   :  { %3283 = vpow2.f32 %v2615_v40 }
 0x432   :  { %v3280_v38 = vpop.eup %3279 }
 0x433   :  { %596 = vrot.lane.b32.xlu0 %v3280_v38, %s3475_s1  ;;  %v3282_v41 = vpop.eup %3281 }
 0x434   :  { %v614_v42 = vadd.f32 1.0, %v3282_v41  ;;  %v3284_v43 = vpop.eup %3283 }
 0x435   :  { %v586_v44 = vadd.f32 1.0, %v3284_v43 }
 0x436   :  { %3285 = vrcp.f32 %v614_v42 }
 0x437   :  { %591 = vrot.lane.b32.xlu0 %v2608_v30, %s3476_s14  ;;  %3287 = vrcp.f32 %v586_v44 }
 0x440   :  { %v3286_v45 = vpop.eup %3285 }
 0x441   :  { %v3288_v49 = vpop.eup %3287  ;;  %v618_v52 = vmul.f32 %v3286_v45, %v3634_v47 }
 0x49b   :  { %v621_v46 = vpop.permute.xlu1 %620 }
 0x49c   :  { %v623_v48 = vmul.f32 %v3286_v45, %v621_v46 }
 0x49e   :  { %625 = vrot.lane.b32.xlu1 %v623_v48, %s3476_s14 }
 0x4a5   :  { %v597_v50 = vpop.permute.xlu0 %596 }
 0x4a6   :  { %v599_v51 = vmul.f32 %v3288_v49, %v597_v50 }
 0x4a8   :  { %601 = vrot.lane.b32.xlu1 %v599_v51, %s3476_s14 }
 0x4a9   :  { %v592_v55 = vpop.permute.xlu0 %591 }
 0x4aa   :  { %v594_v57 = vmul.f32 %v3288_v49, %v592_v55 }
 0x510   :  { %v626_v53 = vpop.permute.xlu1 %625 }
 0x511   :  { %v3756_v54 = vadd.f32 %v626_v53, %v618_v52 }
 0x513   :  { %3289 = vtanh.f32 %v3756_v54 }
 0x51a   :  { %v602_v58 = vpop.permute.xlu1 %601 }
 0x51b   :  { %v3759_v60 = vadd.f32 %v602_v58, %v594_v57 }
 0x51d   :  { %v3290_v61 = vpop.eup %3289  ;;  %3291 = vtanh.f32 %v3759_v60 }
 0x51e   :  { %631 = vrot.lane.b32.xlu0 %v3290_v61, %s3475_s1 }
 0x527   :  { %v3292_v62 = vpop.eup %3291 }
 0x528   :  { %607 = vrot.lane.b32.xlu1 %v3292_v62, %s3475_s1 }
 0x590   :  { %v632_v63 = vpop.permute.xlu0 %631 }
 0x591   :  { %v634_v47 = vmul.f32 %v3286_v45, %v632_v63 }
 0x593   :  { %636 = vrot.lane.b32.xlu0 %v634_v47, %s3476_s14 }
 0x59a   :  { %v608_v0 = vpop.permute.xlu1 %607 }
 0x59b   :  { %v610_v1 = vmul.f32 %v3288_v49, %v608_v0 }
 0x59d   :  { %712 = vrot.lane.b32.xlu1 %v610_v1, %s3476_s14 }
 0x605   :  { %v637_v2 = vpop.permute.xlu0 %636 }
 0x606   :  { %2871 = vmatmul.mubr.msk.f32.vlgmr.msra.gmra.mrb[6].mxu1 %vm254_vm1, %v637_v2 }
 0x607   :  { %3143 = vmatpush3.bf16.msra.mxu1 %v3656_v56  ;;  %2892 = vmatprep.mubr.msk.f32.mxu1 %vm3473_vm0, %v3474_v19 }
 0x608   :  { %3144 = vmatprep.subr.bf16.mxu1 %v3472_v7 }
 0x60b   :  { %3146 = vmatpush3.bf16.msra.mxu1 %v3666_v59 }
 0x60c   :  { %3153 = vmatprep.subr.bf16.mxu1 %v3472_v7 }
 0x60e   :  { %2893 = vmatmul.mubr.msk.f32.vlgmr.msra.gmra.mrb[8].mxu1 %vm254_vm1, %v637_v2 }
 0x60f   :  { %v713_v3 = vpop.permute.xlu1 %712  ;;  %3155 = vmatpush3.bf16.msra.mxu1 %v3694_v11  ;;  %2914 = vmatprep.mubr.msk.f32.mxu1 %vm3473_vm0, %v3474_v19 }
 0x610   :  { %2882 = vmatmul.mubr.msk.f32.vlgmr.msra.gmra.mrb[10].mxu0 %vm254_vm1, %v713_v3  ;;  %3156 = vmatprep.subr.bf16.mxu1 %v3472_v7 }
 0x611   :  { %3149 = vmatpush3.bf16.msra.mxu0 %v3576_v13  ;;  %2903 = vmatprep.mubr.msk.f32.mxu0 %vm3473_vm0, %v3474_v19 }
 0x612   :  { %3150 = vmatprep.subr.bf16.mxu0 %v3472_v7 }
 0x613   :  { %3158 = vmatpush3.bf16.msra.mxu1 %v3705_v16 }
 0x614   :  { %3165 = vmatprep.subr.bf16.mxu1 %v3472_v7 }
 0x615   :  { %3152 = vmatpush3.bf16.msra.mxu0 %v3588_v17 }
 0x616   :  { %3159 = vmatprep.subr.bf16.mxu0 %v3472_v7 }
 0x6d9   :  { %v706_v4 = vpop.f32.mrb[6].mxu1 }
 0x6da   :  { %v710_v5 = vadd.f32 %v706_v4, %v3730_v21  ;;  %v2872_v6 = vpop.f32.mrb[7].mxu1 }
 0x6dc   :  { %3293 = vtanh.f32 %v710_v5  ;;  %v2621_v27 = vmul.f32 -1.442695, %v710_v5 }
 0x6e1   :  { %v852_v8 = vpop.f32.mrb[8].mxu1 }
 0x6e2   :  { %v2894_v9 = vpop.f32.mrb[9].mxu1 }
 0x6e3   :  { %v782_v10 = vpop.f32.mrb[10].mxu0 }
 0x6e4   :  { %v853_v12 = vadd.f32 %v852_v8, %v782_v10  ;;  %v2883_v14 = vpop.f32.mrb[11].mxu0 }
 0x6e6   :  { %v3294_v15 = vpop.eup %3293  ;;  %v856_v18 = vadd.f32 %v3744_v32, %v853_v12 }
 0x6e7   :  { %890 = vrot.lane.b32.xlu0 %v3294_v15, %s3475_s1 }
 0x6e8   :  { %3295 = vtanh.f32 %v856_v18  ;;  %v2620_v28 = vmul.f32 -1.442695, %v856_v18 }
 0x6e9   :  { %3297 = vpow2.f32 %v2621_v27 }
 0x6ea   :  { %3299 = vpow2.f32 %v2620_v28 }
 0x6f2   :  { %v3296_v26 = vpop.eup %3295 }
 0x6f3   :  { %866 = vrot.lane.b32.xlu1 %v3296_v26, %s3475_s1  ;;  %v3298_v21 = vpop.eup %3297 }
 0x6f4   :  { %v884_v29 = vadd.f32 1.0, %v3298_v21  ;;  %v3300_v31 = vpop.eup %3299 }
 0x6f5   :  { %v860_v33 = vadd.f32 1.0, %v3300_v31 }
 0x6f6   :  { %3301 = vrcp.f32 %v884_v29 }
 0x6f7   :  { %3303 = vrcp.f32 %v860_v33 }
 0x700   :  { %v3302_v34 = vpop.eup %3301 }
 0x701   :  { %v3304_v37 = vpop.eup %3303  ;;  %v888_v39 = vmul.f32 %v3302_v34, %v3756_v54 }
 0x702   :  { %v864_v42 = vmul.f32 %v3304_v37, %v3759_v60 }
 0x759   :  { %v891_v35 = vpop.permute.xlu0 %890 }
 0x75a   :  { %v893_v36 = vmul.f32 %v3302_v34, %v891_v35 }
 0x75c   :  { %895 = vrot.lane.b32.xlu0 %v893_v36, %s3476_s14 }
 0x765   :  { %v867_v38 = vpop.permute.xlu1 %866 }
 0x766   :  { %v869_v30 = vmul.f32 %v3304_v37, %v867_v38 }
 0x768   :  { %871 = vrot.lane.b32.xlu1 %v869_v30, %s3476_s14 }
 0x7ce   :  { %v896_v40 = vpop.permute.xlu0 %895 }
 0x7cf   :  { %v3794_v41 = vadd.f32 %v896_v40, %v888_v39 }
 0x7d1   :  { %3305 = vtanh.f32 %v3794_v41 }
 0x7da   :  { %v872_v43 = vpop.permute.xlu1 %871 }
 0x7db   :  { %v3306_v44 = vpop.eup %3305  ;;  %v3798_v45 = vadd.f32 %v872_v43, %v864_v42 }
 0x7dc   :  { %901 = vrot.lane.b32.xlu0 %v3306_v44, %s3475_s1 }
 0x7dd   :  { %3307 = vtanh.f32 %v3798_v45 }
 0x7e7   :  { %v3308_v46 = vpop.eup %3307 }
 0x7e8   :  { %877 = vrot.lane.b32.xlu1 %v3308_v46, %s3475_s1 }
 0x84e   :  { %v902_v48 = vpop.permute.xlu0 %901 }
 0x84f   :  { %v904_v49 = vmul.f32 %v3302_v34, %v902_v48 }
 0x851   :  { %906 = vrot.lane.b32.xlu0 %v904_v49, %s3476_s14 }
 0x85a   :  { %v878_v50 = vpop.permute.xlu1 %877 }
 0x85b   :  { %v880_v51 = vmul.f32 %v3304_v37, %v878_v50 }
 0x85d   :  { %982 = vrot.lane.b32.xlu1 %v880_v51, %s3476_s14 }
 0x8c3   :  { %v907_v52 = vpop.permute.xlu0 %906 }
 0x8c4   :  { %2904 = vmatmul.mubr.msk.f32.vlgmr.msra.gmra.mrb[12].mxu0 %vm254_vm1, %v907_v52 }
 0x8c5   :  { %3161 = vmatpush3.bf16.msra.mxu0 %v3656_v56  ;;  %2925 = vmatprep.mubr.msk.f32.mxu0 %vm3473_vm0, %v3474_v19 }
 0x8c6   :  { %3162 = vmatprep.subr.bf16.mxu0 %v3472_v7 }
 0x8c9   :  { %3164 = vmatpush3.bf16.msra.mxu0 %v3666_v59 }
 0x8ca   :  { %3171 = vmatprep.subr.bf16.mxu0 %v3472_v7 }
 0x8cc   :  { %2926 = vmatmul.mubr.msk.f32.vlgmr.msra.gmra.mrb[14].mxu0 %vm254_vm1, %v907_v52 }
 0x8cd   :  { %3173 = vmatpush3.bf16.msra.mxu0 %v3694_v11  ;;  %2947 = vmatprep.mubr.msk.f32.mxu0 %vm3473_vm0, %v3474_v19 }
 0x8ce   :  { %3174 = vmatprep.subr.bf16.mxu0 %v3472_v7 }
 0x8cf   :  { %v983_v53 = vpop.permute.xlu1 %982 }
 0x8d0   :  { %2915 = vmatmul.mubr.msk.f32.vlgmr.msra.gmra.mrb[10].mxu1 %vm254_vm1, %v983_v53 }
 0x8d1   :  { %3167 = vmatpush3.bf16.msra.mxu1 %v3576_v13  ;;  %2936 = vmatprep.mubr.msk.f32.mxu1 %vm3473_vm0, %v3474_v19 }
 0x8d2   :  { %3168 = vmatprep.subr.bf16.mxu1 %v3472_v7  ;;  %3176 = vmatpush3.bf16.msra.mxu0 %v3705_v16 }
 0x8d3   :  { %3183 = vmatprep.subr.bf16.mxu0 %v3472_v7 }
 0x8d5   :  { %3170 = vmatpush3.bf16.msra.mxu1 %v3588_v17 }
 0x8d6   :  { %3177 = vmatprep.subr.bf16.mxu1 %v3472_v7 }
 0x997   :  { %v976_v54 = vpop.f32.mrb[12].mxu0 }
 0x998   :  { %v980_v55 = vadd.f32 %v3728_v20, %v976_v54  ;;  %v2905_v57 = vpop.f32.mrb[13].mxu0 }
 0x99a   :  { %3309 = vtanh.f32 %v980_v55  ;;  %v2626_v2 = vmul.f32 -1.442695, %v980_v55 }
 0x99f   :  { %v1122_v58 = vpop.f32.mrb[14].mxu0 }
 0x9a0   :  { %v2927_v60 = vpop.f32.mrb[15].mxu0 }
 0x9a3   :  { %v1052_v61 = vpop.f32.mrb[10].mxu1 }
 0x9a4   :  { %v3310_v62 = vpop.eup %3309  ;;  %v1123_v63 = vadd.f32 %v1122_v58, %v1052_v61  ;;  %v2916_v47 = vpop.f32.mrb[11].mxu1 }
 0x9a5   :  { %1160 = vrot.lane.b32.xlu0 %v3310_v62, %s3475_s1 }
 0x9a6   :  { %v1126_v0 = vadd.f32 %v3744_v32, %v1123_v63 }
 0x9a8   :  { %3311 = vtanh.f32 %v1126_v0  ;;  %v2625_v20 = vmul.f32 -1.442695, %v1126_v0 }
 0x9a9   :  { %3313 = vpow2.f32 %v2626_v2 }
 0x9aa   :  { %3315 = vpow2.f32 %v2625_v20 }
 0x9b2   :  { %v3312_v1 = vpop.eup %3311 }
 0x9b3   :  { %1136 = vrot.lane.b32.xlu1 %v3312_v1, %s3475_s1  ;;  %v3314_v3 = vpop.eup %3313 }
 0x9b4   :  { %v1154_v4 = vadd.f32 1.0, %v3314_v3  ;;  %v3316_v5 = vpop.eup %3315 }
 0x9b5   :  { %v1130_v8 = vadd.f32 1.0, %v3316_v5 }
 0x9b6   :  { %3317 = vrcp.f32 %v1154_v4 }
 0x9b7   :  { %3319 = vrcp.f32 %v1130_v8 }
 0x9c0   :  { %v3318_v6 = vpop.eup %3317 }
 0x9c1   :  { %v3320_v12 = vpop.eup %3319  ;;  %v1158_v18 = vmul.f32 %v3318_v6, %v3794_v41 }
 0x9c2   :  { %v1134_v21 = vmul.f32 %v3320_v12, %v3798_v45 }
 0xa17   :  { %v1161_v9 = vpop.permute.xlu0 %1160 }
 0xa18   :  { %v1163_v10 = vmul.f32 %v3318_v6, %v1161_v9 }
 0xa1a   :  { %1165 = vrot.lane.b32.xlu0 %v1163_v10, %s3476_s14 }
 0xa25   :  { %v1137_v14 = vpop.permute.xlu1 %1136 }
 0xa26   :  { %v1139_v15 = vmul.f32 %v3320_v12, %v1137_v14 }
 0xa28   :  { %1141 = vrot.lane.b32.xlu1 %v1139_v15, %s3476_s14 }
 0xa8c   :  { %v1166_v26 = vpop.permute.xlu0 %1165 }
 0xa8d   :  { %v3833_v27 = vadd.f32 %v1166_v26, %v1158_v18 }
 0xa8f   :  { %3321 = vtanh.f32 %v3833_v27 }
 0xa99   :  { %v3322_v28 = vpop.eup %3321 }
 0xa9a   :  { %v1142_v29 = vpop.permute.xlu1 %1141  ;;  %1171 = vrot.lane.b32.xlu0 %v3322_v28, %s3475_s1 }
 0xa9b   :  { %v3838_v31 = vadd.f32 %v1142_v29, %v1134_v21 }
 0xa9d   :  { %3323 = vtanh.f32 %v3838_v31 }
 0xaa7   :  { %v3324_v33 = vpop.eup %3323 }
 0xaa8   :  { %1147 = vrot.lane.b32.xlu1 %v3324_v33, %s3475_s1 }
 0xb0c   :  { %v1172_v34 = vpop.permute.xlu0 %1171 }
 0xb0d   :  { %v1174_v35 = vmul.f32 %v3318_v6, %v1172_v34 }
 0xb0f   :  { %1176 = vrot.lane.b32.xlu0 %v1174_v35, %s3476_s14 }
 0xb1a   :  { %v1148_v36 = vpop.permute.xlu1 %1147 }
 0xb1b   :  { %v1150_v37 = vmul.f32 %v3320_v12, %v1148_v36 }
 0xb1d   :  { %1252 = vrot.lane.b32.xlu1 %v1150_v37, %s3476_s14 }
 0xb81   :  { %v1177_v38 = vpop.permute.xlu0 %1176 }
 0xb82   :  { %2937 = vmatmul.mubr.msk.f32.vlgmr.msra.gmra.mrb[12].mxu1 %vm254_vm1, %v1177_v38 }
 0xb83   :  { %3179 = vmatpush3.bf16.msra.mxu1 %v3656_v56  ;;  %2958 = vmatprep.mubr.msk.f32.mxu1 %vm3473_vm0, %v3474_v19 }
 0xb84   :  { %3180 = vmatprep.subr.bf16.mxu1 %v3472_v7 }
 0xb87   :  { %3182 = vmatpush3.bf16.msra.mxu1 %v3666_v59 }
 0xb88   :  { %3189 = vmatprep.subr.bf16.mxu1 %v3472_v7 }
 0xb8a   :  { %2959 = vmatmul.mubr.msk.f32.vlgmr.msra.gmra.mrb[14].mxu1 %vm254_vm1, %v1177_v38 }
 0xb8b   :  { %3191 = vmatpush3.bf16.msra.mxu1 %v3694_v11  ;;  %2980 = vmatprep.mubr.msk.f32.mxu1 %vm3473_vm0, %v3474_v19 }
 0xb8c   :  { %3192 = vmatprep.subr.bf16.mxu1 %v3472_v7 }
 0xb8f   :  { %v1253_v30 = vpop.permute.xlu1 %1252  ;;  %3194 = vmatpush3.bf16.msra.mxu1 %v3705_v16 }
 0xb90   :  { %2948 = vmatmul.mubr.msk.f32.vlgmr.msra.gmra.mrb[16].mxu0 %vm254_vm1, %v1253_v30  ;;  %3201 = vmatprep.subr.bf16.mxu1 %v3472_v7 }
 0xb91   :  { %3185 = vmatpush3.bf16.msra.mxu0 %v3576_v13  ;;  %2969 = vmatprep.mubr.msk.f32.mxu0 %vm3473_vm0, %v3474_v19 }
 0xb92   :  { %3186 = vmatprep.subr.bf16.mxu0 %v3472_v7 }
 0xb95   :  { %3188 = vmatpush3.bf16.msra.mxu0 %v3588_v17 }
 0xb96   :  { %3195 = vmatprep.subr.bf16.mxu0 %v3472_v7 }
 0xc55   :  { %v1246_v39 = vpop.f32.mrb[12].mxu1 }
 0xc56   :  { %v1250_v40 = vadd.f32 %v1246_v39, %v3734_v23  ;;  %v2938_v41 = vpop.f32.mrb[13].mxu1 }
 0xc58   :  { %3325 = vtanh.f32 %v1250_v40  ;;  %v2631_v51 = vmul.f32 -1.442695, %v1250_v40 }
 0xc5d   :  { %v1392_v42 = vpop.f32.mrb[14].mxu1 }
 0xc5e   :  { %v2960_v43 = vpop.f32.mrb[15].mxu1 }
 0xc62   :  { %v3326_v44 = vpop.eup %3325 }
 0xc63   :  { %v1322_v45 = vpop.f32.mrb[16].mxu0  ;;  %1430 = vrot.lane.b32.xlu0 %v3326_v44, %s3475_s1 }
 0xc64   :  { %v1393_v46 = vadd.f32 %v1392_v42, %v1322_v45  ;;  %v2949_v48 = vpop.f32.mrb[17].mxu0 }
 0xc66   :  { %v1396_v49 = vadd.f32 %v3744_v32, %v1393_v46 }
 0xc68   :  { %3327 = vtanh.f32 %v1396_v49  ;;  %v2630_v23 = vmul.f32 -1.442695, %v1396_v49 }
 0xc69   :  { %3329 = vpow2.f32 %v2631_v51 }
 0xc6a   :  { %3331 = vpow2.f32 %v2630_v23 }
 0xc72   :  { %v3328_v50 = vpop.eup %3327 }
 0xc73   :  { %1406 = vrot.lane.b32.xlu1 %v3328_v50, %s3475_s1  ;;  %v3330_v52 = vpop.eup %3329 }
 0xc74   :  { %v1424_v53 = vadd.f32 1.0, %v3330_v52  ;;  %v3332_v54 = vpop.eup %3331 }
 0xc75   :  { %v1400_v60 = vadd.f32 1.0, %v3332_v54 }
 0xc76   :  { %3333 = vrcp.f32 %v1424_v53 }
 0xc77   :  { %3335 = vrcp.f32 %v1400_v60 }
 0xc80   :  { %v3334_v55 = vpop.eup %3333 }
 0xc81   :  { %v3336_v61 = vpop.eup %3335  ;;  %v1428_v47 = vmul.f32 %v3334_v55, %v3833_v27 }
 0xc82   :  { %v1404_v3 = vmul.f32 %v3336_v61, %v3838_v31 }
 0xcd5   :  { %v1431_v57 = vpop.permute.xlu0 %1430 }
 0xcd6   :  { %v1433_v58 = vmul.f32 %v3334_v55, %v1431_v57 }
 0xcd8   :  { %1435 = vrot.lane.b32.xlu0 %v1433_v58, %s3476_s14 }
 0xce5   :  { %v1407_v62 = vpop.permute.xlu1 %1406 }
 0xce6   :  { %v1409_v63 = vmul.f32 %v3336_v61, %v1407_v62 }
 0xce8   :  { %1411 = vrot.lane.b32.xlu1 %v1409_v63, %s3476_s14 }
 0xd4a   :  { %v1436_v0 = vpop.permute.xlu0 %1435 }
 0xd4b   :  { %v3872_v1 = vadd.f32 %v1436_v0, %v1428_v47 }
 0xd4d   :  { %3337 = vtanh.f32 %v3872_v1 }
 0xd57   :  { %v3338_v2 = vpop.eup %3337 }
 0xd58   :  { %1441 = vrot.lane.b32.xlu0 %v3338_v2, %s3475_s1 }
 0xd5a   :  { %v1412_v20 = vpop.permute.xlu1 %1411 }
 0xd5b   :  { %v3877_v4 = vadd.f32 %v1412_v20, %v1404_v3 }
 0xd5d   :  { %3339 = vtanh.f32 %v3877_v4 }
 0xd67   :  { %v3340_v5 = vpop.eup %3339 }
 0xd68   :  { %1417 = vrot.lane.b32.xlu1 %v3340_v5, %s3475_s1 }
 0xdca   :  { %v1442_v6 = vpop.permute.xlu0 %1441 }
 0xdcb   :  { %v1444_v8 = vmul.f32 %v3334_v55, %v1442_v6 }
 0xdcd   :  { %1446 = vrot.lane.b32.xlu0 %v1444_v8, %s3476_s14 }
 0xdda   :  { %v1418_v9 = vpop.permute.xlu1 %1417 }
 0xddb   :  { %v1420_v10 = vmul.f32 %v3336_v61, %v1418_v9 }
 0xddd   :  { %1522 = vrot.lane.b32.xlu1 %v1420_v10, %s3476_s14 }
 0xe3f   :  { %v1447_v12 = vpop.permute.xlu0 %1446 }
 0xe40   :  { %2970 = vmatmul.mubr.msk.f32.vlgmr.msra.gmra.mrb[18].mxu0 %vm254_vm1, %v1447_v12 }
 0xe41   :  { %3197 = vmatpush3.bf16.msra.mxu0 %v3656_v56  ;;  %2991 = vmatprep.mubr.msk.f32.mxu0 %vm3473_vm0, %v3474_v19 }
 0xe42   :  { %3198 = vmatprep.subr.bf16.mxu0 %v3472_v7 }
 0xe45   :  { %3200 = vmatpush3.bf16.msra.mxu0 %v3666_v59 }
 0xe46   :  { %3207 = vmatprep.subr.bf16.mxu0 %v3472_v7 }
 0xe48   :  { %2992 = vmatmul.mubr.msk.f32.vlgmr.msra.gmra.mrb[20].mxu0 %vm254_vm1, %v1447_v12 }
 0xe49   :  { %3209 = vmatpush3.bf16.msra.mxu0 %v3694_v11  ;;  %3013 = vmatprep.mubr.msk.f32.mxu0 %vm3473_vm0, %v3474_v19 }
 0xe4a   :  { %3210 = vmatprep.subr.bf16.mxu0 %v3472_v7 }
 0xe4d   :  { %3212 = vmatpush3.bf16.msra.mxu0 %v3705_v16 }
 0xe4e   :  { %3219 = vmatprep.subr.bf16.mxu0 %v3472_v7 }
 0xe4f   :  { %v1523_v14 = vpop.permute.xlu1 %1522 }
 0xe50   :  { %2981 = vmatmul.mubr.msk.f32.vlgmr.msra.gmra.mrb[16].mxu1 %vm254_vm1, %v1523_v14 }
 0xe51   :  { %3203 = vmatpush3.bf16.msra.mxu1 %v3576_v13  ;;  %3002 = vmatprep.mubr.msk.f32.mxu1 %vm3473_vm0, %v3474_v19 }
 0xe52   :  { %3204 = vmatprep.subr.bf16.mxu1 %v3472_v7 }
 0xe55   :  { %3206 = vmatpush3.bf16.msra.mxu1 %v3588_v17 }
 0xe56   :  { %3213 = vmatprep.subr.bf16.mxu1 %v3472_v7 }
 0xf13   :  { %v1516_v15 = vpop.f32.mrb[18].mxu0 }
 0xf14   :  { %v1520_v18 = vadd.f32 %v3732_v22, %v1516_v15  ;;  %v2971_v26 = vpop.f32.mrb[19].mxu0 }
 0xf16   :  { %3341 = vtanh.f32 %v1520_v18  ;;  %v2636_v36 = vmul.f32 -1.442695, %v1520_v18 }
 0xf1b   :  { %v1662_v27 = vpop.f32.mrb[20].mxu0 }
 0xf1c   :  { %v2993_v28 = vpop.f32.mrb[21].mxu0 }
 0xf20   :  { %v3342_v21 = vpop.eup %3341 }
 0xf21   :  { %1700 = vrot.lane.b32.xlu0 %v3342_v21, %s3475_s1 }
 0xf23   :  { %v1592_v29 = vpop.f32.mrb[16].mxu1 }
 0xf24   :  { %v1663_v31 = vadd.f32 %v1662_v27, %v1592_v29  ;;  %v2982_v33 = vpop.f32.mrb[17].mxu1 }
 0xf26   :  { %v1666_v34 = vadd.f32 %v3744_v32, %v1663_v31 }
 0xf28   :  { %3343 = vtanh.f32 %v1666_v34  ;;  %v2635_v38 = vmul.f32 -1.442695, %v1666_v34 }
 0xf29   :  { %3345 = vpow2.f32 %v2636_v36 }
 0xf32   :  { %v3344_v35 = vpop.eup %3343 }
 0xf33   :  { %1676 = vrot.lane.b32.xlu1 %v3344_v35, %s3475_s1  ;;  %v3346_v37 = vpop.eup %3345 }
 0xf34   :  { %v1694_v22 = vadd.f32 1.0, %v3346_v37 }
 0xf36   :  { %3347 = vrcp.f32 %v1694_v22 }
 0xf37   :  { %3349 = vpow2.f32 %v2635_v38 }
 0xf40   :  { %v3348_v30 = vpop.eup %3347 }
 0xf41   :  { %v3350_v40 = vpop.eup %3349  ;;  %v1698_v46 = vmul.f32 %v3348_v30, %v3872_v1 }
 0xf42   :  { %v1670_v42 = vadd.f32 1.0, %v3350_v40 }
 0xf44   :  { %3351 = vrcp.f32 %v1670_v42 }
 0xf4e   :  { %v3352_v43 = vpop.eup %3351 }
 0xf4f   :  { %v1674_v51 = vmul.f32 %v3352_v43, %v3877_v4 }
 0xf93   :  { %v1701_v39 = vpop.permute.xlu0 %1700 }
 0xf94   :  { %v1703_v41 = vmul.f32 %v3348_v30, %v1701_v39 }
 0xf96   :  { %1705 = vrot.lane.b32.xlu0 %v1703_v41, %s3476_s14 }
 0xfa5   :  { %v1677_v44 = vpop.permute.xlu1 %1676 }
 0xfa6   :  { %v1679_v45 = vmul.f32 %v3352_v43, %v1677_v44 }
 0xfa8   :  { %1681 = vrot.lane.b32.xlu1 %v1679_v45, %s3476_s14 }
0x1008   :  { %v1706_v48 = vpop.permute.xlu0 %1705 }
0x1009   :  { %v3911_v49 = vadd.f32 %v1706_v48, %v1698_v46 }
0x100b   :  { %3353 = vtanh.f32 %v3911_v49 }
0x1015   :  { %v3354_v50 = vpop.eup %3353 }
0x1016   :  { %1711 = vrot.lane.b32.xlu0 %v3354_v50, %s3475_s1 }
0x101a   :  { %v1682_v52 = vpop.permute.xlu1 %1681 }
0x101b   :  { %v3916_v23 = vadd.f32 %v1682_v52, %v1674_v51 }
0x101d   :  { %3355 = vtanh.f32 %v3916_v23 }
0x1027   :  { %v3356_v53 = vpop.eup %3355 }
0x1028   :  { %1687 = vrot.lane.b32.xlu1 %v3356_v53, %s3475_s1 }
0x1088   :  { %v1712_v54 = vpop.permute.xlu0 %1711 }
0x1089   :  { %v1714_v55 = vmul.f32 %v3348_v30, %v1712_v54 }
0x108b   :  { %1716 = vrot.lane.b32.xlu0 %v1714_v55, %s3476_s14 }
0x109a   :  { %v1688_v57 = vpop.permute.xlu1 %1687 }
0x109b   :  { %v1690_v58 = vmul.f32 %v3352_v43, %v1688_v57 }
0x109d   :  { %1792 = vrot.lane.b32.xlu1 %v1690_v58, %s3476_s14 }
0x10fd   :  { %v1717_v60 = vpop.permute.xlu0 %1716 }
0x10fe   :  { %3003 = vmatmul.mubr.msk.f32.vlgmr.msra.gmra.mrb[18].mxu1 %vm254_vm1, %v1717_v60 }
0x10ff   :  { %3215 = vmatpush3.bf16.msra.mxu1 %v3656_v56  ;;  %3024 = vmatprep.mubr.msk.f32.mxu1 %vm3473_vm0, %v3474_v19 }
0x1100   :  { %3216 = vmatprep.subr.bf16.mxu1 %v3472_v7 }
0x1103   :  { %3218 = vmatpush3.bf16.msra.mxu1 %v3666_v59 }
0x1104   :  { %3225 = vmatprep.subr.bf16.mxu1 %v3472_v7 }
0x1106   :  { %3025 = vmatmul.mubr.msk.f32.vlgmr.msra.gmra.mrb[20].mxu1 %vm254_vm1, %v1717_v60 }
0x1107   :  { %3227 = vmatpush3.bf16.msra.mxu1 %v3694_v11  ;;  %3046 = vmatprep.mubr.msk.f32.mxu1 %vm3473_vm0, %v3474_v19 }
0x1108   :  { %3228 = vmatprep.subr.bf16.mxu1 %v3472_v7 }
0x110b   :  { %3230 = vmatpush3.bf16.msra.mxu1 %v3705_v16 }
0x110c   :  { %3237 = vmatprep.subr.bf16.mxu1 %v3472_v7 }
0x110f   :  { %v1793_v61 = vpop.permute.xlu1 %1792 }
0x1110   :  { %3014 = vmatmul.mubr.msk.f32.vlgmr.msra.gmra.mrb[22].mxu0 %vm254_vm1, %v1793_v61 }
0x1111   :  { %3221 = vmatpush3.bf16.msra.mxu0 %v3576_v13  ;;  %3035 = vmatprep.mubr.msk.f32.mxu0 %vm3473_vm0, %v3474_v19 }
0x1112   :  { %3222 = vmatprep.subr.bf16.mxu0 %v3472_v7 }
0x1115   :  { %3224 = vmatpush3.bf16.msra.mxu0 %v3588_v17 }
0x1116   :  { %3231 = vmatprep.subr.bf16.mxu0 %v3472_v7 }
0x11d1   :  { %v1786_v62 = vpop.f32.mrb[18].mxu1 }
0x11d2   :  { %v1790_v63 = vadd.f32 %v1786_v62, %v3738_v25  ;;  %v3004_v47 = vpop.f32.mrb[19].mxu1 }
0x11d4   :  { %3357 = vtanh.f32 %v1790_v63  ;;  %v2641_v17 = vmul.f32 -1.442695, %v1790_v63 }
0x11d9   :  { %v1932_v0 = vpop.f32.mrb[20].mxu1 }
0x11da   :  { %v3026_v1 = vpop.f32.mrb[21].mxu1 }
0x11de   :  { %v3358_v2 = vpop.eup %3357 }
0x11df   :  { %1970 = vrot.lane.b32.xlu0 %v3358_v2, %s3475_s1 }
0x11e3   :  { %v1862_v13 = vpop.f32.mrb[22].mxu0 }
0x11e4   :  { %v1933_v3 = vadd.f32 %v1932_v0, %v1862_v13  ;;  %v3015_v20 = vpop.f32.mrb[23].mxu0 }
0x11e6   :  { %v1936_v4 = vadd.f32 %v3744_v32, %v1933_v3 }
0x11e8   :  { %3359 = vtanh.f32 %v1936_v4  ;;  %v2640_v8 = vmul.f32 -1.442695, %v1936_v4 }
0x11e9   :  { %3361 = vpow2.f32 %v2641_v17 }
0x11f2   :  { %v3360_v5 = vpop.eup %3359 }
0x11f3   :  { %1946 = vrot.lane.b32.xlu1 %v3360_v5, %s3475_s1  ;;  %v3362_v6 = vpop.eup %3361 }
0x11f4   :  { %v1964_v25 = vadd.f32 1.0, %v3362_v6 }
0x11f6   :  { %3363 = vrcp.f32 %v1964_v25 }
0x11f7   :  { %3365 = vpow2.f32 %v2640_v8 }
0x1200   :  { %v3364_v9 = vpop.eup %3363 }
0x1201   :  { %v3366_v14 = vpop.eup %3365  ;;  %v1968_v28 = vmul.f32 %v3364_v9, %v3911_v49 }
0x1202   :  { %v1940_v15 = vadd.f32 1.0, %v3366_v14 }
0x1204   :  { %3367 = vrcp.f32 %v1940_v15 }
0x120e   :  { %v3368_v18 = vpop.eup %3367 }
0x120f   :  { %v1944_v33 = vmul.f32 %v3368_v18, %v3916_v23 }
0x1251   :  { %v1971_v10 = vpop.permute.xlu0 %1970 }
0x1252   :  { %v1973_v12 = vmul.f32 %v3364_v9, %v1971_v10 }
0x1254   :  { %1975 = vrot.lane.b32.xlu0 %v1973_v12, %s3476_s14 }
0x1265   :  { %v1947_v26 = vpop.permute.xlu1 %1946 }
0x1266   :  { %v1949_v27 = vmul.f32 %v3368_v18, %v1947_v26 }
0x1268   :  { %1951 = vrot.lane.b32.xlu1 %v1949_v27, %s3476_s14 }
0x12c6   :  { %v1976_v21 = vpop.permute.xlu0 %1975 }
0x12c7   :  { %v3950_v29 = vadd.f32 %v1976_v21, %v1968_v28 }
0x12c9   :  { %3369 = vtanh.f32 %v3950_v29 }
0x12d3   :  { %v3370_v31 = vpop.eup %3369 }
0x12d4   :  { %1981 = vrot.lane.b32.xlu0 %v3370_v31, %s3475_s1 }
0x12da   :  { %v1952_v34 = vpop.permute.xlu1 %1951 }
0x12db   :  { %v3955_v35 = vadd.f32 %v1952_v34, %v1944_v33  ;;  %v2450_v34 = vld [vmem:[%s4072_s6 + $0x8] sm:$0xff] }
0x12dd   :  { %3371 = vtanh.f32 %v3955_v35 }
0x12e7   :  { %v3372_v36 = vpop.eup %3371 }
0x12e8   :  { %1957 = vrot.lane.b32.xlu1 %v3372_v36, %s3475_s1 }
0x1346   :  { %v1982_v37 = vpop.permute.xlu0 %1981 }
0x1347   :  { %v1984_v22 = vmul.f32 %v3364_v9, %v1982_v37  ;;  %v2452_v37 = vld [vmem:[%s4072_s6 + $0x18] sm:$0xff] }
0x1349   :  { %1986 = vrot.lane.b32.xlu0 %v1984_v22, %s3476_s14 }
0x135a   :  { %v1958_v38 = vpop.permute.xlu1 %1957 }
0x135b   :  { %v1960_v30 = vmul.f32 %v3368_v18, %v1958_v38 }
0x135d   :  { %2062 = vrot.lane.b32.xlu1 %v1960_v30, %s3476_s14 }
0x13bb   :  { %v1987_v39 = vpop.permute.xlu0 %1986 }
0x13bc   :  { %3036 = vmatmul.mubr.msk.f32.vlgmr.msra.gmra.mrb[24].mxu0 %vm254_vm1, %v1987_v39 }
0x13bd   :  { %3233 = vmatpush3.bf16.msra.mxu0 %v3656_v56  ;;  %3057 = vmatprep.mubr.msk.f32.mxu0 %vm3473_vm0, %v3474_v19 }
0x13be   :  { %3234 = vmatprep.subr.bf16.mxu0 %v3472_v7 }
0x13c1   :  { %3236 = vmatpush3.bf16.msra.mxu0 %v3666_v59 }
0x13c2   :  { %3243 = vmatprep.subr.bf16.mxu0 %v3472_v7 }
0x13c4   :  { %3058 = vmatmul.mubr.msk.f32.vlgmr.msra.gmra.mrb[26].mxu0 %vm254_vm1, %v1987_v39 }
0x13c5   :  { %3245 = vmatpush3.bf16.msra.mxu0 %v3656_v56  ;;  %3079 = vmatprep.mubr.msk.f32.mxu0 %vm3473_vm0, %v3474_v19 }
0x13c6   :  { %3246 = vmatprep.subr.bf16.mxu0 %v3472_v7 }
0x13c9   :  { %3248 = vmatpush3.bf16.msra.mxu0 %v3666_v59 }
0x13cf   :  { %v2063_v40 = vpop.permute.xlu1 %2062 }
0x13d0   :  { %3047 = vmatmul.mubr.msk.f32.vlgmr.msra.gmra.mrb[22].mxu1 %vm254_vm1, %v2063_v40 }
0x13d1   :  { %3239 = vmatpush3.bf16.msra.mxu1 %v3694_v11  ;;  %3068 = vmatprep.mubr.msk.f32.mxu1 %vm3473_vm0, %v3474_v19 }
0x13d2   :  { %3240 = vmatprep.subr.bf16.mxu1 %v3472_v7 }
0x13d5   :  { %3242 = vmatpush3.bf16.msra.mxu1 %v3705_v16 }
0x13d6   :  { %3249 = vmatprep.subr.bf16.mxu1 %v3472_v7 }
0x148f   :  { %v2056_v56 = vpop.f32.mrb[24].mxu0 }
0x1490   :  { %v2060_v41 = vadd.f32 %v3736_v24, %v2056_v56  ;;  %v3037_v42 = vpop.f32.mrb[25].mxu0  ;;  %v2650_v56 = vld [vmem:[%s4073_s7] ss:$0 sm:$0xff]  ;;  %s3478_s7 = smov [#allocation4]  }
0x1492   :  { %3373 = vtanh.f32 %v2060_v41  ;;  %v2646_v16 = vmul.f32 -1.442695, %v2060_v41 }
0x1497   :  { %v2202_v59 = vpop.f32.mrb[26].mxu0 }
0x1498   :  { %v3059_v43 = vpop.f32.mrb[27].mxu0 }
0x149c   :  { %v3374_v44 = vpop.eup %3373 }
0x149d   :  { %2240 = vrot.lane.b32.xlu1 %v3374_v44, %s3475_s1 }
0x14a3   :  { %v2132_v11 = vpop.f32.mrb[22].mxu1 }
0x14a4   :  { %v2203_v45 = vadd.f32 %v2202_v59, %v2132_v11  ;;  %v3048_v46 = vpop.f32.mrb[23].mxu1 }
0x14a6   :  { %v2206_v48 = vadd.f32 %v3744_v32, %v2203_v45 }
0x14a8   :  { %3375 = vtanh.f32 %v2206_v48  ;;  %v2645_v51 = vmul.f32 -1.442695, %v2206_v48 }
0x14a9   :  { %3377 = vpow2.f32 %v2646_v16 }
0x14b2   :  { %v3376_v49 = vpop.eup %3375 }
0x14b3   :  { %2216 = vrot.lane.b32.xlu0 %v3376_v49, %s3475_s1  ;;  %v3378_v50 = vpop.eup %3377 }
0x14b4   :  { %v2234_v24 = vadd.f32 1.0, %v3378_v50 }
0x14b6   :  { %3379 = vrcp.f32 %v2234_v24 }
0x14b7   :  { %3381 = vpow2.f32 %v2645_v51 }
0x14c0   :  { %v3380_v52 = vpop.eup %3379 }
0x14c1   :  { %v3382_v54 = vpop.eup %3381  ;;  %v2238_v61 = vmul.f32 %v3380_v52, %v3950_v29 }
0x14c2   :  { %v2210_v55 = vadd.f32 1.0, %v3382_v54 }
0x14c4   :  { %3383 = vrcp.f32 %v2210_v55 }
0x14ce   :  { %v3384_v57 = vpop.eup %3383 }
0x14cf   :  { %v2214_v0 = vmul.f32 %v3384_v57, %v3955_v35  ;;  %v2451_v35 = vld [vmem:[%s4072_s6 + $0x10] sm:$0xff] }
0x14d0   :  { %v3253_v22 = vpack.c.bf16 %v2452_v37, %v2451_v35 }
0x150f   :  { %v2241_v23 = vpop.permute.xlu1 %2240 }
0x1510   :  { %v2243_v53 = vmul.f32 %v3380_v52, %v2241_v23 }
0x1512   :  { %2245 = vrot.lane.b32.xlu1 %v2243_v53, %s3476_s14 }
0x1525   :  { %v2217_v58 = vpop.permute.xlu0 %2216 }
0x1526   :  { %v2219_v60 = vmul.f32 %v3384_v57, %v2217_v58 }
0x1528   :  { %2221 = vrot.lane.b32.xlu0 %v2219_v60, %s3476_s14 }
0x1584   :  { %v2246_v62 = vpop.permute.xlu1 %2245 }
0x1585   :  { %v3988_v63 = vadd.f32 %v2246_v62, %v2238_v61 }
0x1587   :  { %3385 = vtanh.f32 %v3988_v63 }
0x1591   :  { %v3386_v47 = vpop.eup %3385 }
0x1592   :  { %2251 = vrot.lane.b32.xlu1 %v3386_v47, %s3475_s1 }
0x159a   :  { %v2222_v1 = vpop.permute.xlu0 %2221 }
0x159b   :  { %v2224_v2 = vadd.f32 %v2222_v1, %v2214_v0 }
0x159d   :  { %3387 = vtanh.f32 %v2224_v2 }
0x15a7   :  { %v3388_v13 = vpop.eup %3387 }
0x15a8   :  { %2227 = vrot.lane.b32.xlu0 %v3388_v13, %s3475_s1 }
0x1604   :  { %v2252_v3 = vpop.permute.xlu1 %2251 }
0x1605   :  { %v2254_v20 = vmul.f32 %v3380_v52, %v2252_v3 }
0x1607   :  { %2331 = vrot.lane.b32.xlu1 %v2254_v20, %s3476_s14 }
0x161a   :  { %v2228_v4 = vpop.permute.xlu0 %2227 }
0x161b   :  { %v2230_v5 = vmul.f32 %v3384_v57, %v2228_v4 }
0x161d   :  { %2256 = vrot.lane.b32.xlu0 %v2230_v5, %s3476_s14 }
0x1679   :  { %v2332_v17 = vpop.permute.xlu1 %2331 }
0x167a   :  { %2431 = vst.msk [vmem:[#allocation4] sm:$0xff] %vm254_vm1, %v2332_v17  ;;  %3080 = vmatmul.mubr.msk.f32.vlgmr.msra.gmra.mrb[28].mxu0 %vm254_vm1, %v2332_v17 }
0x168f   :  { %v2257_v6 = vpop.permute.xlu0 %2256 }
0x1690   :  { %3069 = vmatmul.mubr.msk.f32.vlgmr.msra.gmra.mrb[24].mxu1 %vm254_vm1, %v2257_v6 }
0x1691   :  { %3090 = vmatprep.mubr.msk.f32.mxu1 %vm3473_vm0, %v3474_v19 }
0x174d   :  { %v2401_v25 = vpop.f32.mrb[28].mxu0 }
0x174e   :  { %v3081_v8 = vpop.f32.mrb[29].mxu0 }
0x1763   :  { %v2326_v9 = vpop.f32.mrb[24].mxu1 }
0x1764   :  { %v2402_v10 = vadd.f32 %v2401_v25, %v2326_v9  ;;  %v3070_v12 = vpop.f32.mrb[25].mxu1 }
0x1766   :  { %v2405_v14 = vadd.f32 %v3744_v32, %v2402_v10  ;;  %v2449_v32 = vld [vmem:[%s4072_s6] sm:$0xff]  ;;  %s3477_s6 = smov 96  }
0x1767   :  { %v3250_v36 = vpack.c.bf16 %v2450_v34, %v2449_v32 }
0x1768   :  { %3389 = vtanh.f32 %v2405_v14  ;;  %v2649_v18 = vmul.f32 -1.442695, %v2405_v14 }
0x1769   :  { %3251 = vmatpush3.bf16.msra.mxu1 %v3250_v36 }
0x176a   :  { %3391 = vpow2.f32 %v2649_v18  ;;  %3252 = vmatprep.subr.bf16.mxu1 %v3472_v7 }
0x176d   :  { %3254 = vmatpush3.bf16.msra.mxu1 %v3253_v22 }
0x1772   :  { %v3390_v15 = vpop.eup %3389 }
0x1773   :  { %2415 = vrot.lane.b32.xlu0 %v3390_v15, %s3475_s1 }
0x1774   :  { %v3392_v26 = vpop.eup %3391 }
0x1775   :  { %v2409_v27 = vadd.f32 1.0, %v3392_v26 }
0x1777   :  { %3393 = vrcp.f32 %v2409_v27 }
0x1781   :  { %v3394_v28 = vpop.eup %3393 }
0x1782   :  { %v2413_v19 = vmul.f32 %v3394_v28, %v2224_v2 }
0x17e5   :  { %v2416_v21 = vpop.permute.xlu0 %2415 }
0x17e6   :  { %v2418_v29 = vmul.f32 %v3394_v28, %v2416_v21 }
0x17e8   :  { %2420 = vrot.lane.b32.xlu1 %v2418_v29, %s3476_s14 }
0x185a   :  { %v2421_v31 = vpop.permute.xlu1 %2420 }
0x185b   :  { %v2423_v33 = vadd.f32 %v2421_v31, %v2413_v19 }
0x185d   :  { %3395 = vtanh.f32 %v2423_v33 }
0x1867   :  { %v3396_v38 = vpop.eup %3395 }
0x1868   :  { %2426 = vrot.lane.b32.xlu0 %v3396_v38, %s3475_s1  ;;  %s2561_s1 = sshll.u32 %s3478_s7, 4  ;;  %s2562_s1 = int_to_ptr.vmem [resolvable:$true] %s2561_s1 }
0x1869   :  { %p3406_p1 = scmp.lt.s32.totalorder %s2562_s1, %s2562_s1 }
0x18da   :  { %v2427_v30 = vpop.permute.xlu0 %2426 }
0x18db   :  { %v2429_v39 = vmul.f32 %v3394_v28, %v2427_v30 }
0x18dd   :  { %2438 = vrot.lane.b32.xlu1 %v2429_v39, %s3476_s14  ;;  %s3401_s14 = scalar_lea.vmem %s2562_s1, 256 }
0x18de   :  { %p3402_p0 = scmp.ne.s32.totalorder %s2562_s1, %s3401_s14  ;;  %p3407_p2 = scmp.lt.s32.totalorder %s3401_s14, %s3401_s14 }
0x18e0   :  { %p3408_p3 = por %p3407_p2, %p3406_p1 }
0x18e2   :  { %p3409_p4 = pnand %p3408_p3, %p3402_p0 }
0x194f   :  { %v2439_v40 = vpop.permute.xlu1 %2438 }
0x1950   :  { %2442 = vst.msk [vmem:[#allocation4 + $0x8] sm:$0xff] %vm254_vm1, %v2439_v40  ;;  %3091 = vmatmul.mubr.msk.f32.vlgmr.msra.gmra.mrb[26].mxu1 %vm254_vm1, %v2439_v40 }
0x1a23   :  { %v2528_v41 = vpop.f32.mrb[26].mxu1 }
0x1a24   :  { %v2529_v7 = vadd.f32 %v2650_v56, %v2528_v41  ;;  %v3092_v42 = vpop.f32.mrb[27].mxu1 }
0x1a26   :  { %v2533_v59 = vsel %vm2532_vm11, %v2529_v7, -inf }
0x1a27   :  { %2534 = vmax.xlane.f32.xlu0 %v2533_v59 }
0x1a3d   :  { %2433 = vrot.lane.b32.xlu0 %v3988_v63, %s3477_s6 }
0x1ab4   :  { %v2535_v43 = vpop.xlane.xlu0 %2534 }
0x1ab5   :  { %v2536_v44 = vsub.f32 %v2529_v7, %v2535_v43 }
0x1ab7   :  { %v2537_v11 = vmul.f32 1.442695, %v2536_v44 }
0x1ab8   :  { %v2434_v45 = vpop.permute.xlu0 %2433 }
0x1ab9   :  { %3397 = vpow2.f32 %v2537_v11  ;;  %2436 = vst.msk [vmem:[#allocation6] sm:$0xff] %vm254_vm1, %v2434_v45 }
0x1ac3   :  { %v3398_v46 = vpop.eup %3397 }
0x1ac4   :  { %v2539_v48 = vsel %vm2532_vm11, %v3398_v46, 0.0 }
0x1ac5   :  { %2540 = vadd.xlane.f32.xlu1 %v2539_v48 }
0x1ad6   :  { %2444 = vrot.lane.b32.xlu1 %v2423_v33, %s3477_s6 }
0x1ad7   :  { %3412 = shalt.err (!%p3409_p4)
}
0x1ad8   :  { %s3413_s17 = scalar_lea.hbm %s4077_s11, 256 }
0x1ad9   :  { %p3414_p5 = scmp.ne.s32.totalorder %s4077_s11, %s3413_s17  ;;  %p3417_p6 = scmp.lt.u32.totalorder %s3413_s17, %s4077_s11 }
0x1adb   :  { %p3419_p7 = pnand %p3417_p6, %p3414_p5 }
0x1add   :  { %3422 = shalt.err (!%p3419_p7)
}
0x1ade   :  { %s3479_s22 = smov 128   ;;  %s3480_s4 = smov 8  }
0x1adf   :  { %2567 = dma.vmem_to_hbm [thread:$0]  %s2562_s1, 256, %s4077_s11, [#allocation5], %s3479_s22, %s3479_s22, %s3480_s4  }
0x1ae0   :  { %s3481_s24 = smov [#allocation6]  }
0x1ae1   :  { %s2573_s25 = sshll.u32 %s3481_s24, 4  ;;  %s2574_s25 = int_to_ptr.vmem [resolvable:$true] %s2573_s25 }
0x1ae2   :  { %s3423_s26 = scalar_lea.vmem %s2574_s25, 256  ;;  %p3428_p9 = scmp.lt.s32.totalorder %s2574_s25, %s2574_s25 }
0x1ae3   :  { %p3424_p8 = scmp.ne.s32.totalorder %s2574_s25, %s3423_s26  ;;  %p3429_p10 = scmp.lt.s32.totalorder %s3423_s26, %s3423_s26 }
0x1ae5   :  { %p3430_p11 = por %p3429_p10, %p3428_p9 }
0x1ae7   :  { %p3431_p12 = pnand %p3430_p11, %p3424_p8 }
0x1b52   :  { %v2541_v49 = vpop.xlane.xlu1 %2540 }
0x1b53   :  { %3399 = vlog2.f32 %v2541_v49 }
0x1b56   :  { %v2445_v16 = vpop.permute.xlu1 %2444 }
0x1b57   :  { %2448 = vst.msk [vmem:[#allocation6 + $0x8] sm:$0xff] %vm254_vm1, %v2445_v16 }
0x1b58   :  { %3434 = shalt.err (!%p3431_p12)
}
0x1b59   :  { %s3435_s2 = scalar_lea.hbm %s4078_s12, 256 }
0x1b5a   :  { %p3436_p13 = scmp.ne.s32.totalorder %s4078_s12, %s3435_s2  ;;  %p3439_p0 = scmp.lt.u32.totalorder %s3435_s2, %s4078_s12 }
0x1b5c   :  { %p3441_p1 = pnand %p3439_p0, %p3436_p13 }
0x1b5e   :  { %3444 = shalt.err (!%p3441_p1)
}
0x1b5f   :  { %2579 = dma.vmem_to_hbm [thread:$0]  %s2574_s25, 256, %s4078_s12, [#allocation5], %s3479_s22, %s3479_s22, %s3480_s4   ;;  %v3400_v50 = vpop.eup %3399 }
0x1b60   :  { %s3482_s15 = smov [#allocation2]   ;;  %v2543_v24 = vmul.f32 0.6931472, %v3400_v50 }
0x1b61   :  { %s2552_s16 = sshll.u32 %s3482_s15, 4  ;;  %s2553_s16 = int_to_ptr.vmem [resolvable:$true] %s2552_s16 }
0x1b62   :  { %v2544_v51 = vsub.f32 %v2536_v44, %v2543_v24  ;;  %s3445_s6 = scalar_lea.vmem %s2553_s16, 128  ;;  %p3450_p3 = scmp.lt.s32.totalorder %s2553_s16, %s2553_s16 }
0x1b63   :  { %p3446_p2 = scmp.ne.s32.totalorder %s2553_s16, %s3445_s6  ;;  %p3451_p4 = scmp.lt.s32.totalorder %s3445_s6, %s3445_s6 }
0x1b64   :  { %2545 = vst.msk [vmem:[#allocation2] sm:$0xff] %vm2532_vm11, %v2544_v51 }
0x1b65   :  { %p3452_p5 = por %p3451_p4, %p3450_p3 }
0x1b67   :  { %p3453_p6 = pnand %p3452_p5, %p3446_p2 }
0x1b69   :  { %3456 = shalt.err (!%p3453_p6)
}
0x1b6a   :  { %s3457_s14 = scalar_lea.hbm %s4076_s10, 128 }
0x1b6b   :  { %p3458_p7 = scmp.ne.s32.totalorder %s4076_s10, %s3457_s14  ;;  %p3461_p8 = scmp.lt.u32.totalorder %s3457_s14, %s4076_s10 }
0x1b6d   :  { %p3463_p9 = pnand %p3461_p8, %p3458_p7 }
0x1b6f   :  { %3466 = shalt.err (!%p3463_p9)
}
0x1b70   :  { %2555 = dma.vmem_to_hbm [thread:$0]  %s2553_s16, 128, %s4076_s10, [#allocation3]  }
0x1b71   :  { %3467 = dma.done.wait [#allocation3], 128  }
0x1b72   :  { %3468 = vsyncadd [#allocation3], 4294967168 }
0x1b73   :  { %3469 = dma.done.wait [#allocation5], 512  }
0x1b74   :  { %3470 = vsyncadd [#allocation5], 4294966784 }
0x1b75   :  { %2589 = vsyncpa [#allocation3], 1 }
0x1b76   :  { %2590 = vsyncpa [#allocation5], 1 }

</bundles_post_ra>
